<compile_context>
chip_gen: v6e
topology: v6e:2x2x1
jax: 0.10.0
libtpu: 0.0.40
codegen_flags: <defaults>
</compile_context>

<pallas_src>
import functools

import jax
import jax.numpy as jnp
from jax.experimental import pallas as pl
from jax.experimental.pallas import tpu as pltpu

EPS = 1e-5


def mlp_kernel(x_ref, w1_ref, gamma_ref, beta_ref, w2_ref, b2_ref, o_ref, *, t_valid):
    # Shapes (Tp = T padded to a multiple of 8, Pp = P padded to a multiple of 128):
    #   x_ref:  (Bblk, Tp, D)  input dtype      w1_ref: (D, H)  bf16
    #   gamma/beta: (1, H) f32                  w2_ref: (H, Pp) bf16 (padded cols = 0)
    #   b2_ref: (1, Pp) f32                     o_ref:  (Bblk, Tp, Pp)
    bblk, tp, d = x_ref.shape
    h = w1_ref.shape[1]
    pp = w2_ref.shape[1]

    # ---- fc1 (no bias): bf16 operands, fp32 accumulation on the MXU ----
    x2 = x_ref[...].reshape(bblk * tp, d)
    if x2.dtype != jnp.bfloat16:
        x2 = x2.astype(jnp.bfloat16)
    h3 = jnp.dot(x2, w1_ref[...],
                 preferred_element_type=jnp.float32).reshape(bblk, tp, h)

    # ---- Fp32GroupNorm(groups == channels): per-(batch, channel) stats over time ----
    # Zero-padded time rows are exactly zero after fc1 (no bias), so they contribute
    # nothing to the sums; divide by the true T instead of the padded one.
    inv_t = 1.0 / float(t_valid)
    s1 = jnp.sum(h3, axis=1)                              # (Bblk, H)
    s2 = jnp.sum(h3 * h3, axis=1)                         # (Bblk, H)
    mean = s1 * inv_t
    var = jnp.maximum(s2 * inv_t - mean * mean, 0.0)      # biased var, clamp cancellation
    inv = jax.lax.rsqrt(var + EPS)
    scale = inv * gamma_ref[...]                          # (Bblk, H)
    shift = beta_ref[...] - mean * scale                  # (Bblk, H)

    # ---- normalize + ReLU + bf16 cast fused, then fc2 (with bias), lane-dense store ----
    hr = jnp.maximum(h3 * scale[:, None, :] + shift[:, None, :], 0.0).astype(jnp.bfloat16)
    out = jnp.dot(hr.reshape(bblk * tp, h), w2_ref[...],
                  preferred_element_type=jnp.float32) + b2_ref[...]
    o_ref[...] = out.reshape(bblk, tp, pp).astype(o_ref.dtype)


def _round_up(v, m):
    return (v + m - 1) // m * m


def _tpu_vmem_and_cores():
    """Per-TensorCore VMEM capacity and TensorCores/chip (generation-aware tuning)."""
    vmem_cap = 128 * 1024 * 1024
    num_cores = 1
    try:
        info = pltpu.get_tpu_info()
        vmem_cap = int(getattr(info, "vmem_capacity_bytes", vmem_cap) or vmem_cap)
        for attr in ("num_cores", "tensorcores_per_chip", "cores_per_chip",
                     "num_tensor_cores"):
            v = getattr(info, attr, None)
            if v:
                num_cores = int(v)
                break
    except Exception:
        pass
    if vmem_cap <= 0:
        vmem_cap = 128 * 1024 * 1024
    # v7x exposes 64 MiB VMEM per TensorCore and has 2 TCs/chip; use VMEM as a hint
    # when the core count is not reported.
    if num_cores <= 1 and vmem_cap <= 64 * 1024 * 1024:
        num_cores = 2
    return vmem_cap, max(1, num_cores)


def _pick_block_batch(B, *, rows_per_batch, bytes_per_batch, weight_bytes,
                      vmem_cap, num_cores, target_rows=1024):
    """Largest batch block (a divisor of B) such that
       * the MXU M dimension (bblk * rows_per_batch) is around `target_rows`,
       * the block fits the generation-aware VMEM budget,
       * on multi-TensorCore chips (v7x only) the grid still has >= num_cores steps."""
    divisors = [d for d in range(1, B + 1) if B % d == 0]
    want = max(1, -(-target_rows // rows_per_batch))          # ceil(target / rows)
    bblk = max(d for d in divisors if d <= want)
    budget = int(vmem_cap * 0.70) - 2 * weight_bytes - (2 << 20)
    while bblk > 1 and bblk * bytes_per_batch > budget:
        bblk = max(d for d in divisors if d < bblk)
    if num_cores > 1 and B // bblk < num_cores:               # megacore split: v7x only
        smaller = [d for d in divisors if B // d >= num_cores]
        if smaller:
            bblk = max(smaller)
    return bblk


def mlp_forward(x, w1_t, gamma, beta, w2_t, b2, *, out_dtype=None):
    """x: (B, T, D).  Weights in (in, out) layout: w1_t (D, H), w2_t (H, P); b2 (P,)."""
    B, T, D = x.shape
    H = w1_t.shape[1]
    P = w2_t.shape[1]
    out_dtype = out_dtype or x.dtype

    # ---- padding for layout: T -> multiple of 8 (sublanes), P -> multiple of 128 (lanes)
    Tp = _round_up(T, 8)
    Pp = _round_up(P, 128)
    xp = x if Tp == T else jnp.pad(x, ((0, 0), (0, Tp - T), (0, 0)))
    w1b = w1_t.astype(jnp.bfloat16)
    w2b = w2_t.astype(jnp.bfloat16)
    b2p = b2
    if Pp != P:
        w2b = jnp.pad(w2b, ((0, 0), (0, Pp - P)))
        b2p = jnp.pad(b2p, (0, Pp - P))
    gamma2 = gamma.reshape(1, H).astype(jnp.float32)
    beta2 = beta.reshape(1, H).astype(jnp.float32)
    b2p = b2p.reshape(1, Pp).astype(jnp.float32)

    # ---- generation-aware block sizing ----
    vmem_cap, num_cores = _tpu_vmem_and_cores()
    x_bytes = jnp.dtype(xp.dtype).itemsize
    o_bytes = jnp.dtype(out_dtype).itemsize
    # Per-batch-element VMEM: double-buffered x/out blocks + live intermediates
    # (fp32 fc1 result + fp32 temp headroom + bf16 fc2 operand).
    bytes_per_batch = Tp * (2 * D * x_bytes + 2 * Pp * o_bytes) + Tp * H * (4 + 4 + 2)
    weight_bytes = (w1b.size + w2b.size) * 2 + (gamma2.size + beta2.size + b2p.size) * 4
    bblk = _pick_block_batch(B, rows_per_batch=Tp, bytes_per_batch=bytes_per_batch,
                             weight_bytes=weight_bytes, vmem_cap=vmem_cap,
                             num_cores=num_cores)
    grid = (B // bblk,)

    needed = bblk * bytes_per_batch + 2 * weight_bytes + (2 << 20)
    soft_cap = int(vmem_cap * 0.70)           # ~90 MiB on v5e/v6e, ~45 MiB on v7x
    hard_cap = int(vmem_cap - (6 << 20))      # always leave Mosaic scratch headroom
    vmem_limit = int(max(32 << 20, min(max(needed, soft_cap), hard_cap)))

    cost = pl.CostEstimate(
        flops=2 * B * T * (D * H + H * P),
        transcendentals=B * H,
        bytes_accessed=(xp.size * x_bytes + (w1b.size + w2b.size) * 2
                        + (gamma2.size + beta2.size + b2p.size) * 4
                        + B * Tp * Pp * o_bytes),
    )

    kernel = functools.partial(mlp_kernel, t_valid=T)
    out_shape = jax.ShapeDtypeStruct((B, Tp, Pp), out_dtype)

    def run(single_buffer_consts):
        def cspec(shape):
            # Grid-invariant operands: a second pipeline buffer is pure VMEM waste.
            if single_buffer_consts:
                return pl.BlockSpec(shape, lambda g: (0, 0),
                                    pipeline_mode=pl.Buffered(1))
            return pl.BlockSpec(shape, lambda g: (0, 0))

        return pl.pallas_call(
            kernel,
            out_shape=out_shape,
            grid_spec=pltpu.PrefetchScalarGridSpec(
                num_scalar_prefetch=0,
                grid=grid,
                in_specs=[
                    pl.BlockSpec((bblk, Tp, D), lambda g: (g, 0, 0)),   # x block
                    cspec((D, H)),        # W1^T (bf16)
                    cspec((1, H)),        # gamma
                    cspec((1, H)),        # beta
                    cspec((H, Pp)),       # W2^T (bf16, lane-padded)
                    cspec((1, Pp)),       # fc2 bias (lane-padded)
                ],
                out_specs=pl.BlockSpec((bblk, Tp, Pp), lambda g: (g, 0, 0)),
            ),
            compiler_params=pltpu.CompilerParams(
                dimension_semantics=("parallel",),
                vmem_limit_bytes=vmem_limit,
            ),
            cost_estimate=cost,
        )(xp, w1b, gamma2, beta2, w2b, b2p)

    try:
        out_f = run(True)
    except Exception:
        # pipeline_mode=pl.Buffered is a newer knob; fall back to default
        # double-buffering of the (small) constant operands if unsupported.
        out_f = run(False)

    return out_f[:, :T, :P]


def init_params(key, dim, hidden_size, projection_size):
    k1, k2 = jax.random.split(key, 2)
    # xavier_normal_: std = sqrt(2 / (fan_in + fan_out)); PyTorch weight shape (out, in)
    std1 = (2.0 / (dim + hidden_size)) ** 0.5
    w1 = jax.random.normal(k1, (hidden_size, dim), jnp.float32) * std1
    std2 = (2.0 / (hidden_size + projection_size)) ** 0.5
    w2 = jax.random.normal(k2, (projection_size, hidden_size), jnp.float32) * std2
    gamma = jnp.ones((hidden_size,), jnp.float32)     # GroupNorm weight
    beta = jnp.zeros((hidden_size,), jnp.float32)     # GroupNorm bias
    b2 = jnp.zeros((projection_size,), jnp.float32)   # fc2.bias (zero-init per module)
    return w1.T, gamma, beta, w2.T, b2                # (in, out) layout for the kernel


def reference_forward(x, w1_t, gamma, beta, w2_t, b2, matmul_dtype=jnp.float32):
    """Pure-JAX reference mirroring the PyTorch forward (matmul operand dtype optional)."""
    h = jnp.einsum("btd,dh->bth", x.astype(matmul_dtype), w1_t.astype(matmul_dtype),
                   preferred_element_type=jnp.float32)
    ht = jnp.transpose(h, (0, 2, 1))                              # (B, H, T)
    mean = jnp.mean(ht, axis=-1, keepdims=True)
    var = jnp.mean((ht - mean) ** 2, axis=-1, keepdims=True)
    htn = (ht - mean) / jnp.sqrt(var + EPS)
    htn = htn * gamma[None, :, None] + beta[None, :, None]
    hr = jnp.maximum(htn, 0.0)
    hr = jnp.transpose(hr, (0, 2, 1))                             # (B, T, H)
    return jnp.einsum("bth,hp->btp", hr.astype(matmul_dtype), w2_t.astype(matmul_dtype),
                      preferred_element_type=jnp.float32) + b2[None, None, :]


if __name__ == "__main__":
    # --- Case 1: small demo shapes (T already sublane-aligned; P=64 lane-padded to 128)
    B, T, D = 8, 16, 32      # batch, seq, dim
    H, P = 128, 64           # hidden_size, projection_size (small demo sizes)
    key = jax.random.PRNGKey(0)
    kx, kp = jax.random.split(key)
    x = jax.random.normal(kx, (B, T, D), jnp.float32)
    w1_t, gamma, beta, w2_t, b2 = init_params(kp, D, H, P)

    out = jax.block_until_ready(mlp_forward(x, w1_t, gamma, beta, w2_t, b2))
    assert out.shape == (B, T, P), out.shape
    # Tight check against a reference using the same bf16 matmul operands / fp32 accum.
    ref_bf16 = reference_forward(x, w1_t, gamma, beta, w2_t, b2, jnp.bfloat16)
    assert jnp.allclose(out, ref_bf16, atol=1e-2, rtol=1e-2), \
        float(jnp.max(jnp.abs(out - ref_bf16)))
    # Loose check against the exact fp32 PyTorch semantics (bf16 operand rounding only).
    ref_f32 = reference_forward(x, w1_t, gamma, beta, w2_t, b2, jnp.float32)
    assert jnp.allclose(out, ref_f32, atol=1e-1, rtol=1e-1), \
        float(jnp.max(jnp.abs(out - ref_f32)))

    # --- Case 2: ragged shapes exercising the padding path (T 20->24, P 48->128) with
    #             non-trivial GroupNorm affine parameters and fc2 bias.
    B2, T2, D2, H2, P2 = 4, 20, 48, 128, 48
    ks = jax.random.split(jax.random.PRNGKey(1), 6)
    x2 = jax.random.normal(ks[0], (B2, T2, D2), jnp.float32)
    w1p = jax.random.normal(ks[1], (D2, H2), jnp.float32) * 0.1
    w2p = jax.random.normal(ks[2], (H2, P2), jnp.float32) * 0.1
    g2 = 1.0 + 0.1 * jax.random.normal(ks[3], (H2,), jnp.float32)
    be2 = 0.1 * jax.random.normal(ks[4], (H2,), jnp.float32)
    bb2 = 0.1 * jax.random.normal(ks[5], (P2,), jnp.float32)

    out2 = jax.block_until_ready(mlp_forward(x2, w1p, g2, be2, w2p, bb2))
    assert out2.shape == (B2, T2, P2), out2.shape
    ref2 = reference_forward(x2, w1p, g2, be2, w2p, bb2, jnp.bfloat16)
    assert jnp.allclose(out2, ref2, atol=1e-2, rtol=1e-2), \
        float(jnp.max(jnp.abs(out2 - ref2)))

    print("KERNEL_OK")
</pallas_src>

<mosaic_0001>
module attributes {stable_mosaic.version = 11 : i64} {
  func.func @mlp_kernel(%arg0: i32, %arg1: memref<8x16x32xf32, #tpu.memory_space<vmem>>, %arg2: memref<32x128xbf16, #tpu.memory_space<vmem>>, %arg3: memref<1x128xf32, #tpu.memory_space<vmem>>, %arg4: memref<1x128xf32, #tpu.memory_space<vmem>>, %arg5: memref<128x128xbf16, #tpu.memory_space<vmem>>, %arg6: memref<1x128xf32, #tpu.memory_space<vmem>>, %arg7: memref<8x16x128xf32, #tpu.memory_space<vmem>>) attributes {dimension_semantics = [#tpu.dimension_semantics<parallel>], iteration_bounds = array<i64: 1>, scalar_prefetch = 0 : i64, scratch_operands = 0 : i64, tpu.core_type = #tpu.core_type<tc>, window_params = [{transform_indices = @transform_0, window_bounds = array<i64: 8, 16, 32>}, {pipeline_mode = #tpu.pipeline_mode<synchronous>, transform_indices = @transform_1, window_bounds = array<i64: 32, 128>}, {pipeline_mode = #tpu.pipeline_mode<synchronous>, transform_indices = @transform_2, window_bounds = array<i64: 1, 128>}, {pipeline_mode = #tpu.pipeline_mode<synchronous>, transform_indices = @transform_3, window_bounds = array<i64: 1, 128>}, {pipeline_mode = #tpu.pipeline_mode<synchronous>, transform_indices = @transform_4, window_bounds = array<i64: 128, 128>}, {pipeline_mode = #tpu.pipeline_mode<synchronous>, transform_indices = @transform_5, window_bounds = array<i64: 1, 128>}, {transform_indices = @transform_6, window_bounds = array<i64: 8, 16, 128>}]} {
    %c0 = arith.constant 0 : index
    %c0_0 = arith.constant 0 : index
    %c0_1 = arith.constant 0 : index
    %0 = vector.load %arg1[%c0, %c0_0, %c0_1] : memref<8x16x32xf32, #tpu.memory_space<vmem>>, vector<8x16x32xf32>
    %1 = vector.shape_cast %0 : vector<8x16x32xf32> to vector<128x32xf32>
    %2 = arith.truncf %1 : vector<128x32xf32> to vector<128x32xbf16>
    %c0_2 = arith.constant 0 : index
    %c0_3 = arith.constant 0 : index
    %3 = vector.load %arg2[%c0_2, %c0_3] : memref<32x128xbf16, #tpu.memory_space<vmem>>, vector<32x128xbf16>
    %cst = arith.constant dense<0.000000e+00> : vector<128x128xf32>
    %4 = tpu.matmul %2, %3, %cst {dimension_numbers = #tpu.dot_dimension_numbers<[1], [0], [0], [1], [0, 0, 1, 1], [], []>} : vector<128x32xbf16>, vector<32x128xbf16>, vector<128x128xf32> -> vector<128x128xf32>
    %5 = vector.shape_cast %4 : vector<128x128xf32> to vector<8x16x128xf32>
    %cst_4 = arith.constant dense<0.000000e+00> : vector<8x128xf32>
    %6 = vector.multi_reduction <add>, %5, %cst_4 [1] : vector<8x16x128xf32> to vector<8x128xf32>
    %7 = arith.mulf %5, %5 : vector<8x16x128xf32>
    %cst_5 = arith.constant dense<0.000000e+00> : vector<8x128xf32>
    %8 = vector.multi_reduction <add>, %7, %cst_5 [1] : vector<8x16x128xf32> to vector<8x128xf32>
    %cst_6 = arith.constant 6.250000e-02 : f32
    %9 = vector.broadcast %cst_6 : f32 to vector<8x128xf32>
    %10 = arith.mulf %6, %9 : vector<8x128xf32>
    %cst_7 = arith.constant 6.250000e-02 : f32
    %11 = vector.broadcast %cst_7 : f32 to vector<8x128xf32>
    %12 = arith.mulf %8, %11 : vector<8x128xf32>
    %13 = arith.mulf %10, %10 : vector<8x128xf32>
    %14 = arith.subf %12, %13 : vector<8x128xf32>
    %cst_8 = arith.constant 0.000000e+00 : f32
    %15 = vector.broadcast %cst_8 : f32 to vector<8x128xf32>
    %16 = arith.maximumf %14, %15 : vector<8x128xf32>
    %cst_9 = arith.constant 9.99999974E-6 : f32
    %17 = vector.broadcast %cst_9 : f32 to vector<8x128xf32>
    %18 = arith.addf %16, %17 : vector<8x128xf32>
    %19 = math.rsqrt %18 : vector<8x128xf32>
    %c0_10 = arith.constant 0 : index
    %c0_11 = arith.constant 0 : index
    %20 = vector.load %arg3[%c0_10, %c0_11] : memref<1x128xf32, #tpu.memory_space<vmem>>, vector<1x128xf32>
    %21 = vector.broadcast %20 : vector<1x128xf32> to vector<8x128xf32>
    %22 = arith.mulf %19, %21 : vector<8x128xf32>
    %c0_12 = arith.constant 0 : index
    %c0_13 = arith.constant 0 : index
    %23 = vector.load %arg4[%c0_12, %c0_13] : memref<1x128xf32, #tpu.memory_space<vmem>>, vector<1x128xf32>
    %24 = arith.mulf %10, %22 : vector<8x128xf32>
    %25 = vector.broadcast %23 : vector<1x128xf32> to vector<8x128xf32>
    %26 = arith.subf %25, %24 : vector<8x128xf32>
    %27 = vector.shape_cast %22 : vector<8x128xf32> to vector<8x1x128xf32>
    %28 = vector.broadcast %27 : vector<8x1x128xf32> to vector<8x16x128xf32>
    %29 = arith.mulf %5, %28 : vector<8x16x128xf32>
    %30 = vector.shape_cast %26 : vector<8x128xf32> to vector<8x1x128xf32>
    %31 = vector.broadcast %30 : vector<8x1x128xf32> to vector<8x16x128xf32>
    %32 = arith.addf %29, %31 : vector<8x16x128xf32>
    %cst_14 = arith.constant 0.000000e+00 : f32
    %33 = vector.broadcast %cst_14 : f32 to vector<8x16x128xf32>
    %34 = arith.maximumf %32, %33 : vector<8x16x128xf32>
    %35 = arith.truncf %34 : vector<8x16x128xf32> to vector<8x16x128xbf16>
    %36 = vector.shape_cast %35 : vector<8x16x128xbf16> to vector<128x128xbf16>
    %c0_15 = arith.constant 0 : index
    %c0_16 = arith.constant 0 : index
    %37 = vector.load %arg5[%c0_15, %c0_16] : memref<128x128xbf16, #tpu.memory_space<vmem>>, vector<128x128xbf16>
    %cst_17 = arith.constant dense<0.000000e+00> : vector<128x128xf32>
    %38 = tpu.matmul %36, %37, %cst_17 {dimension_numbers = #tpu.dot_dimension_numbers<[1], [0], [0], [1], [0, 0, 1, 1], [], []>} : vector<128x128xbf16>, vector<128x128xbf16>, vector<128x128xf32> -> vector<128x128xf32>
    %c0_18 = arith.constant 0 : index
    %c0_19 = arith.constant 0 : index
    %39 = vector.load %arg6[%c0_18, %c0_19] : memref<1x128xf32, #tpu.memory_space<vmem>>, vector<1x128xf32>
    %40 = vector.broadcast %39 : vector<1x128xf32> to vector<128x128xf32>
    %41 = arith.addf %38, %40 : vector<128x128xf32>
    %42 = vector.shape_cast %41 : vector<128x128xf32> to vector<8x16x128xf32>
    %c0_20 = arith.constant 0 : index
    %c0_21 = arith.constant 0 : index
    %c0_22 = arith.constant 0 : index
    %43 = vector.load %arg7[%c0_20, %c0_21, %c0_22] : memref<8x16x128xf32, #tpu.memory_space<vmem>>, vector<8x16x128xf32>
    tpu.vector_store %arg7[%c0_20, %c0_21, %c0_22], %42 {strides = array<i32>} : memref<8x16x128xf32, #tpu.memory_space<vmem>>, vector<8x16x128xf32>,
    return
  }
  func.func @transform_0(%arg0: i32) -> (i32, i32, i32) {
    %c0_i32 = arith.constant 0 : i32
    %c0_i32_0 = arith.constant 0 : i32
    %c0_i32_1 = arith.constant 0 : i32
    return %arg0, %c0_i32, %c0_i32_0 : i32, i32, i32
  }
  func.func @transform_1(%arg0: i32) -> (i32, i32) {
    %c0_i32 = arith.constant 0 : i32
    %c0_i32_0 = arith.constant 0 : i32
    %c0_i32_1 = arith.constant 0 : i32
    return %c0_i32, %c0_i32_0 : i32, i32
  }
  func.func @transform_2(%arg0: i32) -> (i32, i32) {
    %c0_i32 = arith.constant 0 : i32
    %c0_i32_0 = arith.constant 0 : i32
    %c0_i32_1 = arith.constant 0 : i32
    return %c0_i32, %c0_i32_0 : i32, i32
  }
  func.func @transform_3(%arg0: i32) -> (i32, i32) {
    %c0_i32 = arith.constant 0 : i32
    %c0_i32_0 = arith.constant 0 : i32
    %c0_i32_1 = arith.constant 0 : i32
    return %c0_i32, %c0_i32_0 : i32, i32
  }
  func.func @transform_4(%arg0: i32) -> (i32, i32) {
    %c0_i32 = arith.constant 0 : i32
    %c0_i32_0 = arith.constant 0 : i32
    %c0_i32_1 = arith.constant 0 : i32
    return %c0_i32, %c0_i32_0 : i32, i32
  }
  func.func @transform_5(%arg0: i32) -> (i32, i32) {
    %c0_i32 = arith.constant 0 : i32
    %c0_i32_0 = arith.constant 0 : i32
    %c0_i32_1 = arith.constant 0 : i32
    return %c0_i32, %c0_i32_0 : i32, i32
  }
  func.func @transform_6(%arg0: i32) -> (i32, i32, i32) {
    %c0_i32 = arith.constant 0 : i32
    %c0_i32_0 = arith.constant 0 : i32
    %c0_i32_1 = arith.constant 0 : i32
    return %arg0, %c0_i32, %c0_i32_0 : i32, i32, i32
  }
}

module attributes {stable_mosaic.version = 11 : i64} {
  func.func @mlp_kernel(%arg0: i32, %arg1: memref<8x16x32xf32, #tpu.memory_space<vmem>>, %arg2: memref<32x128xbf16, #tpu.memory_space<vmem>>, %arg3: memref<1x128xf32, #tpu.memory_space<vmem>>, %arg4: memref<1x128xf32, #tpu.memory_space<vmem>>, %arg5: memref<128x128xbf16, #tpu.memory_space<vmem>>, %arg6: memref<1x128xf32, #tpu.memory_space<vmem>>, %arg7: memref<8x16x128xf32, #tpu.memory_space<vmem>>) attributes {dimension_semantics = [#tpu.dimension_semantics<parallel>], iteration_bounds = array<i64: 1>, scalar_prefetch = 0 : i64, scratch_operands = 0 : i64, tpu.core_type = #tpu.core_type<tc>, window_params = [{transform_indices = @transform_0, window_bounds = array<i64: 8, 16, 32>}, {pipeline_mode = #tpu.pipeline_mode<synchronous>, transform_indices = @transform_1, window_bounds = array<i64: 32, 128>}, {pipeline_mode = #tpu.pipeline_mode<synchronous>, transform_indices = @transform_2, window_bounds = array<i64: 1, 128>}, {pipeline_mode = #tpu.pipeline_mode<synchronous>, transform_indices = @transform_3, window_bounds = array<i64: 1, 128>}, {pipeline_mode = #tpu.pipeline_mode<synchronous>, transform_indices = @transform_4, window_bounds = array<i64: 128, 128>}, {pipeline_mode = #tpu.pipeline_mode<synchronous>, transform_indices = @transform_5, window_bounds = array<i64: 1, 128>}, {transform_indices = @transform_6, window_bounds = array<i64: 8, 16, 128>}]} {
    %c0 = arith.constant 0 : index
    %c0_0 = arith.constant 0 : index
    %c0_1 = arith.constant 0 : index
    %0 = vector.load %arg1[%c0, %c0_0, %c0_1] : memref<8x16x32xf32, #tpu.memory_space<vmem>>, vector<8x16x32xf32>
    %1 = vector.shape_cast %0 : vector<8x16x32xf32> to vector<128x32xf32>
    %2 = arith.truncf %1 : vector<128x32xf32> to vector<128x32xbf16>
    %c0_2 = arith.constant 0 : index
    %c0_3 = arith.constant 0 : index
    %3 = vector.load %arg2[%c0_2, %c0_3] : memref<32x128xbf16, #tpu.memory_space<vmem>>, vector<32x128xbf16>
    %cst = arith.constant dense<0.000000e+00> : vector<128x128xf32>
    %4 = tpu.matmul %2, %3, %cst {dimension_numbers = #tpu.dot_dimension_numbers<[1], [0], [0], [1], [0, 0, 1, 1], [], []>} : vector<128x32xbf16>, vector<32x128xbf16>, vector<128x128xf32> -> vector<128x128xf32>
    %5 = vector.shape_cast %4 : vector<128x128xf32> to vector<8x16x128xf32>
    %cst_4 = arith.constant dense<0.000000e+00> : vector<8x128xf32>
    %6 = vector.multi_reduction <add>, %5, %cst_4 [1] : vector<8x16x128xf32> to vector<8x128xf32>
    %7 = arith.mulf %5, %5 : vector<8x16x128xf32>
    %cst_5 = arith.constant dense<0.000000e+00> : vector<8x128xf32>
    %8 = vector.multi_reduction <add>, %7, %cst_5 [1] : vector<8x16x128xf32> to vector<8x128xf32>
    %cst_6 = arith.constant 6.250000e-02 : f32
    %9 = vector.broadcast %cst_6 : f32 to vector<8x128xf32>
    %10 = arith.mulf %6, %9 : vector<8x128xf32>
    %cst_7 = arith.constant 6.250000e-02 : f32
    %11 = vector.broadcast %cst_7 : f32 to vector<8x128xf32>
    %12 = arith.mulf %8, %11 : vector<8x128xf32>
    %13 = arith.mulf %10, %10 : vector<8x128xf32>
    %14 = arith.subf %12, %13 : vector<8x128xf32>
    %cst_8 = arith.constant 0.000000e+00 : f32
    %15 = vector.broadcast %cst_8 : f32 to vector<8x128xf32>
    %16 = arith.maximumf %14, %15 : vector<8x128xf32>
    %cst_9 = arith.constant 9.99999974E-6 : f32
    %17 = vector.broadcast %cst_9 : f32 to vector<8x128xf32>
    %18 = arith.addf %16, %17 : vector<8x128xf32>
    %19 = math.rsqrt %18 : vector<8x128xf32>
    %c0_10 = arith.constant 0 : index
    %c0_11 = arith.constant 0 : index
    %20 = vector.load %arg3[%c0_10, %c0_11] : memref<1x128xf32, #tpu.memory_space<vmem>>, vector<1x128xf32>
    %21 = vector.broadcast %20 : vector<1x128xf32> to vector<8x128xf32>
    %22 = arith.mulf %19, %21 : vector<8x128xf32>
    %c0_12 = arith.constant 0 : index
    %c0_13 = arith.constant 0 : index
    %23 = vector.load %arg4[%c0_12, %c0_13] : memref<1x128xf32, #tpu.memory_space<vmem>>, vector<1x128xf32>
    %24 = arith.mulf %10, %22 : vector<8x128xf32>
    %25 = vector.broadcast %23 : vector<1x128xf32> to vector<8x128xf32>
    %26 = arith.subf %25, %24 : vector<8x128xf32>
    %27 = vector.shape_cast %22 : vector<8x128xf32> to vector<8x1x128xf32>
    %28 = vector.broadcast %27 : vector<8x1x128xf32> to vector<8x16x128xf32>
    %29 = arith.mulf %5, %28 : vector<8x16x128xf32>
    %30 = vector.shape_cast %26 : vector<8x128xf32> to vector<8x1x128xf32>
    %31 = vector.broadcast %30 : vector<8x1x128xf32> to vector<8x16x128xf32>
    %32 = arith.addf %29, %31 : vector<8x16x128xf32>
    %cst_14 = arith.constant 0.000000e+00 : f32
    %33 = vector.broadcast %cst_14 : f32 to vector<8x16x128xf32>
    %34 = arith.maximumf %32, %33 : vector<8x16x128xf32>
    %35 = arith.truncf %34 : vector<8x16x128xf32> to vector<8x16x128xbf16>
    %36 = vector.shape_cast %35 : vector<8x16x128xbf16> to vector<128x128xbf16>
    %c0_15 = arith.constant 0 : index
    %c0_16 = arith.constant 0 : index
    %37 = vector.load %arg5[%c0_15, %c0_16] : memref<128x128xbf16, #tpu.memory_space<vmem>>, vector<128x128xbf16>
    %cst_17 = arith.constant dense<0.000000e+00> : vector<128x128xf32>
    %38 = tpu.matmul %36, %37, %cst_17 {dimension_numbers = #tpu.dot_dimension_numbers<[1], [0], [0], [1], [0, 0, 1, 1], [], []>} : vector<128x128xbf16>, vector<128x128xbf16>, vector<128x128xf32> -> vector<128x128xf32>
    %c0_18 = arith.constant 0 : index
    %c0_19 = arith.constant 0 : index
    %39 = vector.load %arg6[%c0_18, %c0_19] : memref<1x128xf32, #tpu.memory_space<vmem>>, vector<1x128xf32>
    %40 = vector.broadcast %39 : vector<1x128xf32> to vector<128x128xf32>
    %41 = arith.addf %38, %40 : vector<128x128xf32>
    %42 = vector.shape_cast %41 : vector<128x128xf32> to vector<8x16x128xf32>
    %c0_20 = arith.constant 0 : index
    %c0_21 = arith.constant 0 : index
    %c0_22 = arith.constant 0 : index
    %43 = vector.load %arg7[%c0_20, %c0_21, %c0_22] : memref<8x16x128xf32, #tpu.memory_space<vmem>>, vector<8x16x128xf32>
    tpu.vector_store %arg7[%c0_20, %c0_21, %c0_22], %42 {strides = array<i32>} : memref<8x16x128xf32, #tpu.memory_space<vmem>>, vector<8x16x128xf32>,
    return
  }
  func.func @transform_0(%arg0: i32) -> (i32, i32, i32) {
    %c0_i32 = arith.constant 0 : i32
    %c0_i32_0 = arith.constant 0 : i32
    %c0_i32_1 = arith.constant 0 : i32
    return %arg0, %c0_i32, %c0_i32_0 : i32, i32, i32
  }
  func.func @transform_1(%arg0: i32) -> (i32, i32) {
    %c0_i32 = arith.constant 0 : i32
    %c0_i32_0 = arith.constant 0 : i32
    %c0_i32_1 = arith.constant 0 : i32
    return %c0_i32, %c0_i32_0 : i32, i32
  }
  func.func @transform_2(%arg0: i32) -> (i32, i32) {
    %c0_i32 = arith.constant 0 : i32
    %c0_i32_0 = arith.constant 0 : i32
    %c0_i32_1 = arith.constant 0 : i32
    return %c0_i32, %c0_i32_0 : i32, i32
  }
  func.func @transform_3(%arg0: i32) -> (i32, i32) {
    %c0_i32 = arith.constant 0 : i32
    %c0_i32_0 = arith.constant 0 : i32
    %c0_i32_1 = arith.constant 0 : i32
    return %c0_i32, %c0_i32_0 : i32, i32
  }
  func.func @transform_4(%arg0: i32) -> (i32, i32) {
    %c0_i32 = arith.constant 0 : i32
    %c0_i32_0 = arith.constant 0 : i32
    %c0_i32_1 = arith.constant 0 : i32
    return %c0_i32, %c0_i32_0 : i32, i32
  }
  func.func @transform_5(%arg0: i32) -> (i32, i32) {
    %c0_i32 = arith.constant 0 : i32
    %c0_i32_0 = arith.constant 0 : i32
    %c0_i32_1 = arith.constant 0 : i32
    return %c0_i32, %c0_i32_0 : i32, i32
  }
  func.func @transform_6(%arg0: i32) -> (i32, i32, i32) {
    %c0_i32 = arith.constant 0 : i32
    %c0_i32_0 = arith.constant 0 : i32
    %c0_i32_1 = arith.constant 0 : i32
    return %arg0, %c0_i32, %c0_i32_0 : i32, i32, i32
  }
}

</mosaic_0001>

<bundles_post_ra>
// kernel: tpu_custom_call.1
= control target key start
LH: loop header
LB: loop body
LE: loop exit
PB: predicated region body
PF: predicated region fallthrough
CT: control target
= control target key end

     0   :  { %11 = vsyncpa [#allocation3], 0  ;;  %s1324_s0 = inlined_call_operand.hbm [shape: f32[8,16,32], index: 0, kind: input, shape index: {}]   ;;  %s1325_s1 = inlined_call_operand.hbm [shape: bf16[32,128], index: 1, kind: input, shape index: {}]   ;;  %s1326_s2 = inlined_call_operand.vmem [shape: f32[1,128], index: 2, kind: input, shape index: {}]   ;;  %s1327_s3 = inlined_call_operand.vmem [shape: f32[1,128], index: 3, kind: input, shape index: {}]   ;;  %s1328_s4 = inlined_call_operand.hbm [shape: bf16[128,128], index: 4, kind: input, shape index: {}]   ;;  %s1329_s5 = inlined_call_operand.vmem [shape: f32[1,128], index: 5, kind: input, shape index: {}]   ;;  %s1330_s6 = inlined_call_operand.hbm [shape: f32[8,16,128], index: 6, kind: output, shape index: {}]  }
   0x1   :  { %12 = vsyncpa [#allocation6], 0 }
   0x2   :  { %13 = vsyncpa [#allocation4], 0  ;;  %s1089_s21 = smov [#allocation5]  }
   0x3   :  { %s31_s22 = sshll.u32 %s1089_s21, 4  ;;  %s32_s22 = int_to_ptr.vmem [resolvable:$true] %s31_s22 }
   0x4   :  { %s1011_s23 = scalar_lea.vmem %s32_s22, 256  ;;  %p1016_p1 = scmp.lt.s32.totalorder %s32_s22, %s32_s22 }
   0x5   :  { %p1012_p0 = scmp.ne.s32.totalorder %s32_s22, %s1011_s23  ;;  %p1017_p2 = scmp.lt.s32.totalorder %s1011_s23, %s1011_s23 }
   0x7   :  { %p1018_p3 = por %p1017_p2, %p1016_p1 }
   0x9   :  { %p1019_p4 = pnand %p1018_p3, %p1012_p0 }
   0xb   :  { %1022 = shalt.err (!%p1019_p4)
}
   0xc   :  { %s1090_s24 = smov 64   ;;  %s1091_s25 = smov 4  }
   0xd   :  { %37 = dma.hbm_to_vmem [thread:$0]  %s1325_s1, 256, %s32_s22, [#allocation6], %s1090_s24, %s1090_s24, %s1091_s25  }
   0xe   :  { %s1092_s28 = smov [#allocation2]  }
   0xf   :  { %s19_s29 = sshll.u32 %s1092_s28, 4  ;;  %s20_s29 = int_to_ptr.vmem [resolvable:$true] %s19_s29 }
  0x10   :  { %s1031_s30 = scalar_lea.vmem %s20_s29, 2048  ;;  %p1036_p6 = scmp.lt.s32.totalorder %s20_s29, %s20_s29 }
  0x11   :  { %p1032_p5 = scmp.ne.s32.totalorder %s20_s29, %s1031_s30  ;;  %p1037_p7 = scmp.lt.s32.totalorder %s1031_s30, %s1031_s30 }
  0x13   :  { %p1038_p8 = por %p1037_p7, %p1036_p6 }
  0x15   :  { %p1039_p9 = pnand %p1038_p8, %p1032_p5 }
  0x17   :  { %1042 = shalt.err (!%p1039_p9)
}
  0x18   :  { %s1093_s7 = smov 128   ;;  %s1094_s8 = smov 8  }
  0x19   :  { %25 = dma.hbm_to_vmem [thread:$0]  %s1324_s0, 2048, %s20_s29, [#allocation3], %s1093_s7, %s1093_s7, %s1094_s8  }
  0x1a   :  { %s1095_s1 = smov [#allocation7]  }
  0x1b   :  { %s47_s11 = sshll.u32 %s1095_s1, 4  ;;  %s48_s11 = int_to_ptr.vmem [resolvable:$true] %s47_s11 }
  0x1c   :  { %s1051_s12 = scalar_lea.vmem %s48_s11, 1024  ;;  %p1056_p11 = scmp.lt.s32.totalorder %s48_s11, %s48_s11 }
  0x1d   :  { %p1052_p10 = scmp.ne.s32.totalorder %s48_s11, %s1051_s12  ;;  %p1057_p12 = scmp.lt.s32.totalorder %s1051_s12, %s1051_s12 }
  0x1f   :  { %p1058_p13 = por %p1057_p12, %p1056_p11 }
  0x21   :  { %p1059_p0 = pnand %p1058_p13, %p1052_p10 }
  0x23   :  { %1062 = shalt.err (!%p1059_p0)
}
  0x24   :  { %53 = dma.hbm_to_vmem [thread:$0]  %s1328_s4, 1024, %s48_s11, [#allocation6], %s1090_s24, %s1090_s24, %s1091_s25  }
  0x25   :  { %1083 = dma.done.wait [#allocation3], 2048  }
  0x26   :  { %1084 = vsyncadd [#allocation3], 4294965248 }
  0x27   :  { %1085 = dma.done.wait [#allocation6], 1280  }
  0x28   :  { %1086 = vsyncadd [#allocation6], 4294966016  ;;  %v977_v0 = vld [vmem:[#allocation5 + $0x8] sm:$0xff]   ;;  %v978_v1 = vld [vmem:[#allocation5] sm:$0xff]   ;;  %vm106_vm0 = vcmask 261120   ;;  %vm451_vm1 = vcmask 1041409  }
  0x29   :  { %900 = vmatprep.subr.bf16.mxu0 %v977_v0  ;;  %v66_v2 = vld [vmem:[#allocation2] sm:$0xff]  ;;  %v67_v3 = vld [vmem:[#allocation2 + $0x8] sm:$0xff]  ;;  %v68_v5 = vld [vmem:[#allocation2 + $0x10] sm:$0xff]  ;;  %vm454_vm2 = vcmask 1042434   ;;  %vm457_vm3 = vcmask 1043459   ;;  %vm460_vm4 = vcmask 1044484  }
  0x2a   :  { %901 = vmatpush3.bf16.msra.mxu0 %v977_v0  ;;  %v82_v4 = vpack.c.bf16 %v67_v3, %v66_v2  ;;  %v69_v6 = vld [vmem:[#allocation2 + $0x18] sm:$0xff]  ;;  %v70_v7 = vld [vmem:[#allocation2 + $0x20] sm:$0xff]  ;;  %v71_v8 = vld [vmem:[#allocation2 + $0x28] sm:$0xff]  ;;  %vm463_vm5 = vcmask 1045509   ;;  %vm466_vm6 = vcmask 1046534   ;;  %vm469_vm7 = vcmask 1047559  }
  0x2b   :  { %902 = vmatprep.subr.bf16.mxu0 %v978_v1  ;;  %v83_v9 = vpack.c.bf16 %v69_v6, %v68_v5  ;;  %v84_v10 = vpack.c.bf16 %v71_v8, %v70_v7  ;;  %v72_v11 = vld [vmem:[#allocation2 + $0x30] sm:$0xff]  ;;  %v73_v12 = vld [vmem:[#allocation2 + $0x38] sm:$0xff]  ;;  %v74_v13 = vld [vmem:[#allocation2 + $0x40] sm:$0xff] }
  0x2c   :  { %904 = vmatprep.mubr.msk.bf16.mxu0 %vm106_vm0, %v82_v4  ;;  %v75_v14 = vld [vmem:[#allocation2 + $0x48] sm:$0xff]  ;;  %v85_v15 = vpack.c.bf16 %v73_v12, %v72_v11  ;;  %v76_v17 = vld [vmem:[#allocation2 + $0x50] sm:$0xff]  ;;  %v77_v18 = vld [vmem:[#allocation2 + $0x58] sm:$0xff] }
  0x2d   :  { %v86_v16 = vpack.c.bf16 %v75_v14, %v74_v13  ;;  %v78_v19 = vld [vmem:[#allocation2 + $0x60] sm:$0xff]  ;;  %v79_v20 = vld [vmem:[#allocation2 + $0x68] sm:$0xff]  ;;  %v87_v21 = vpack.c.bf16 %v77_v18, %v76_v17  ;;  %v80_v23 = vld [vmem:[#allocation2 + $0x70] sm:$0xff] }
  0x2e   :  { %903 = vmatpush3.bf16.msra.mxu0 %v978_v1  ;;  %v88_v22 = vpack.c.bf16 %v79_v20, %v78_v19  ;;  %v81_v24 = vld [vmem:[#allocation2 + $0x78] sm:$0xff]  ;;  %v979_v26 = vld [vmem:[#allocation7 + $0x38] sm:$0xff]   ;;  %v980_v27 = vld [vmem:[#allocation7 + $0x30] sm:$0xff]  }
  0x2f   :  { %v89_v25 = vpack.c.bf16 %v81_v24, %v80_v23  ;;  %920 = vmatprep.subr.bf16.mxu0 %v979_v26  ;;  %952 = vmatprep.subr.bf16.mxu1 %v979_v26  ;;  %v981_v28 = vld [vmem:[#allocation7 + $0x28] sm:$0xff]   ;;  %v982_v29 = vld [vmem:[#allocation7 + $0x20] sm:$0xff]   ;;  %v983_v30 = vld [vmem:[#allocation7 + $0x18] sm:$0xff]  }
  0x30   :  { %960 = vmatpush3.bf16.msra.mxu1 %v979_v26  ;;  %v984_v31 = vld [vmem:[#allocation7 + $0x10] sm:$0xff]   ;;  %v985_v32 = vld [vmem:[#allocation7 + $0x8] sm:$0xff]   ;;  %v986_v33 = vld [vmem:[#allocation7] sm:$0xff]  }
  0x31   :  { %905 = vmatmul.mubr.msk.bf16.vlgmr.msra.gmra.mxu0 %vm106_vm0, %v83_v9  ;;  %953 = vmatprep.subr.bf16.mxu1 %v980_v27 }
  0x32   :  { %908 = vmatprep.mubr.msk.bf16.mxu0 %vm106_vm0, %v84_v10  ;;  %921 = vmatpush3.bf16.msra.mxu0 %v979_v26 }
  0x33   :  { %922 = vmatprep.subr.bf16.mxu0 %v980_v27 }
  0x34   :  { %961 = vmatpush3.bf16.msra.mxu1 %v980_v27 }
  0x35   :  { %954 = vmatprep.subr.bf16.mxu1 %v981_v28 }
  0x36   :  { %923 = vmatpush3.bf16.msra.mxu0 %v980_v27 }
  0x37   :  { %924 = vmatprep.subr.bf16.mxu0 %v981_v28 }
  0x38   :  { %962 = vmatpush3.bf16.msra.mxu1 %v981_v28 }
  0x39   :  { %909 = vmatmul.mubr.msk.bf16.gmra.mxu0 %vm106_vm0, %v85_v15  ;;  %955 = vmatprep.subr.bf16.mxu1 %v982_v29 }
  0x3a   :  { %912 = vmatprep.mubr.msk.bf16.mxu0 %vm106_vm0, %v86_v16  ;;  %925 = vmatpush3.bf16.msra.mxu0 %v981_v28 }
  0x3b   :  { %926 = vmatprep.subr.bf16.mxu0 %v982_v29 }
  0x3c   :  { %963 = vmatpush3.bf16.msra.mxu1 %v982_v29 }
  0x3d   :  { %956 = vmatprep.subr.bf16.mxu1 %v983_v30 }
  0x3e   :  { %927 = vmatpush3.bf16.msra.mxu0 %v982_v29 }
  0x3f   :  { %928 = vmatprep.subr.bf16.mxu0 %v983_v30 }
  0x40   :  { %964 = vmatpush3.bf16.msra.mxu1 %v983_v30 }
  0x41   :  { %913 = vmatmul.mubr.msk.bf16.gmra.mxu0 %vm106_vm0, %v87_v21  ;;  %957 = vmatprep.subr.bf16.mxu1 %v984_v31 }
  0x42   :  { %916 = vmatprep.mubr.msk.bf16.mxu0 %vm106_vm0, %v88_v22  ;;  %929 = vmatpush3.bf16.msra.mxu0 %v983_v30 }
  0x43   :  { %930 = vmatprep.subr.bf16.mxu0 %v984_v31 }
  0x44   :  { %965 = vmatpush3.bf16.msra.mxu1 %v984_v31 }
  0x45   :  { %958 = vmatprep.subr.bf16.mxu1 %v985_v32 }
  0x46   :  { %931 = vmatpush3.bf16.msra.mxu0 %v984_v31 }
  0x47   :  { %932 = vmatprep.subr.bf16.mxu0 %v985_v32 }
  0x48   :  { %966 = vmatpush3.bf16.msra.mxu1 %v985_v32 }
  0x49   :  { %917 = vmatmul.mubr.msk.bf16.gmra.mxu0 %vm106_vm0, %v89_v25  ;;  %959 = vmatprep.subr.bf16.mxu1 %v986_v33 }
  0x4a   :  { %933 = vmatpush3.bf16.msra.mxu0 %v985_v32 }
  0x4b   :  { %934 = vmatprep.subr.bf16.mxu0 %v986_v33 }
  0x4c   :  { %967 = vmatpush3.bf16.msra.mxu1 %v986_v33 }
  0x4e   :  { %935 = vmatpush3.bf16.msra.mxu0 %v986_v33 }
  0xf1   :  { %v1153_v34 = vpop.f32.mrf.mxu0 }
  0xf2   :  { %v286_v37 = vmul.f32 %v1153_v34, %v1153_v34 }
  0xf3   :  { %v1155_v35 = vpop.f32.mrf.mxu0 }
  0xf4   :  { %v284_v40 = vmul.f32 %v1155_v35, %v1155_v35 }
  0xf5   :  { %v1157_v36 = vpop.f32.mrf.mxu0 }
  0xf6   :  { %v235_v38 = vadd.f32 %v1157_v36, %v1153_v34  ;;  %v287_v39 = vmul.f32 %v1157_v36, %v1157_v36 }
  0xf7   :  { %v1167_v41 = vpop.f32.mrf.mxu0 }
  0xf8   :  { %v236_v42 = vrot.slane %v235_v38, 4  ;;  %v307_v43 = vadd.f32 %v287_v39, %v286_v37  ;;  %v228_v44 = vadd.f32 %v1167_v41, %v1155_v35  ;;  %v285_v45 = vmul.f32 %v1167_v41, %v1167_v41 }
  0xf9   :  { %v1173_v46 = vpop.f32.mrf.mxu0 }
  0xfa   :  { %v237_v47 = vadd.f32 %v236_v42, %v235_v38  ;;  %v308_v48 = vrot.slane %v307_v43, 4  ;;  %v229_v49 = vrot.slane %v228_v44, 4  ;;  %v300_v50 = vadd.f32 %v285_v45, %v284_v40 }
  0xfb   :  { %v1175_v51 = vpop.f32.mrf.mxu0  ;;  %v290_v60 = vmul.f32 %v1173_v46, %v1173_v46 }
  0xfc   :  { %v238_v52 = vrot.slane %v237_v47, 2  ;;  %v309_v53 = vadd.f32 %v308_v48, %v307_v43  ;;  %v230_v54 = vadd.f32 %v229_v49, %v228_v44  ;;  %v301_v55 = vrot.slane %v300_v50, 4 }
  0xfd   :  { %v1177_v56 = vpop.f32.mrf.mxu0  ;;  %v288_v3 = vmul.f32 %v1175_v51, %v1175_v51 }
  0xfe   :  { %v239_v57 = vadd.f32 %v238_v52, %v237_v47  ;;  %v310_v58 = vrot.slane %v309_v53, 2  ;;  %v302_v59 = vadd.f32 %v301_v55, %v300_v50  ;;  %v249_v61 = vadd.f32 %v1177_v56, %v1173_v46 }
  0xff   :  { %v291_v62 = vmul.f32 %v1177_v56, %v1177_v56  ;;  %v1185_v63 = vpop.f32.mrf.mxu0  ;;  %v231_v2 = vrot.slane %v230_v54, 2 }
 0x100   :  { %v240_v0 = vrot.slane %v239_v57, 1  ;;  %v311_v1 = vadd.f32 %v310_v58, %v309_v53  ;;  %v250_v4 = vrot.slane %v249_v61, 4  ;;  %v242_v6 = vadd.f32 %v1185_v63, %v1175_v51 }
 0x101   :  { %v321_v5 = vadd.f32 %v291_v62, %v290_v60  ;;  %v289_v7 = vmul.f32 %v1185_v63, %v1185_v63  ;;  %v1193_v8 = vpop.f32.mrf.mxu0  ;;  %v303_v9 = vrot.slane %v302_v59, 2  ;;  %v232_v15 = vadd.f32 %v231_v2, %v230_v54 }
 0x102   :  { %v251_v10 = vadd.f32 %v250_v4, %v249_v61  ;;  %v243_v12 = vrot.slane %v242_v6, 4  ;;  %v241_v16 = vadd.f32 %v240_v0, %v239_v57  ;;  %v312_v17 = vrot.slane %v311_v1, 1 }
 0x103   :  { %v322_v11 = vrot.slane %v321_v5, 4  ;;  %v314_v13 = vadd.f32 %v289_v7, %v288_v3  ;;  %v1195_v14 = vpop.f32.mrf.mxu0  ;;  %v304_v21 = vadd.f32 %v303_v9, %v302_v59  ;;  %v233_v27 = vrot.slane %v232_v15, 1 }
 0x104   :  { %v244_v18 = vadd.f32 %v243_v12, %v242_v6  ;;  %v252_v22 = vrot.slane %v251_v10, 2  ;;  %v313_v28 = vadd.f32 %v312_v17, %v311_v1  ;;  %v1201_v29 = vmul.f32 0.0625, %v241_v16 }
 0x105   :  { %v315_v19 = vrot.slane %v314_v13, 4  ;;  %v1197_v20 = vpop.f32.mrf.mxu0  ;;  %v323_v23 = vadd.f32 %v322_v11, %v321_v5  ;;  %v305_v33 = vrot.slane %v304_v21, 1  ;;  %v234_v43 = vadd.f32 %v233_v27, %v232_v15 }
 0x106   :  { %v245_v24 = vrot.slane %v244_v18, 2  ;;  %v263_v37 = vadd.f32 %v1197_v20, %v1193_v8  ;;  %v253_v38 = vadd.f32 %v252_v22, %v251_v10  ;;  %v294_v44 = vmul.f32 %v1193_v8, %v1193_v8 }
 0x107   :  { %v316_v25 = vadd.f32 %v315_v19, %v314_v13  ;;  %v1199_v26 = vpop.f32.mrf.mxu0  ;;  %v324_v39 = vrot.slane %v323_v23, 2  ;;  %v295_v47 = vmul.f32 %v1197_v20, %v1197_v20  ;;  %v365_v48 = vmul.f32 0.0625, %v313_v28 }
 0x108   :  { %v246_v30 = vadd.f32 %v245_v24, %v244_v18  ;;  %v264_v45 = vrot.slane %v263_v37, 4  ;;  %v373_v49 = vmul.f32 %v1201_v29, %v1201_v29  ;;  %v306_v57 = vadd.f32 %v305_v33, %v304_v21 }
 0x109   :  { %v317_v31 = vrot.slane %v316_v25, 2  ;;  %v1203_v32 = vpop.f32.mrf.mxu0  ;;  %v335_v55 = vadd.f32 %v295_v47, %v294_v44  ;;  %v254_v58 = vrot.slane %v253_v38, 1  ;;  %v325_v59 = vadd.f32 %v324_v39, %v323_v23 }
 0x10a   :  { %v247_v40 = vrot.slane %v246_v30, 1  ;;  %v265_v54 = vadd.f32 %v264_v45, %v263_v37  ;;  %v1215_v60 = vmul.f32 0.0625, %v234_v43  ;;  %v256_v0 = vadd.f32 %v1199_v26, %v1195_v14 }
 0x10b   :  { %v318_v42 = vadd.f32 %v317_v31, %v316_v25  ;;  %v1213_v52 = vpop.f32.mrf.mxu0  ;;  %v336_v62 = vrot.slane %v335_v55, 4  ;;  %v381_v1 = vsub.f32 %v365_v48, %v373_v49  ;;  %v292_v3 = vmul.f32 %v1195_v14, %v1195_v14 }
 0x10c   :  { %v248_v53 = vadd.f32 %v247_v40, %v246_v30  ;;  %v266_v61 = vrot.slane %v265_v54, 2  ;;  %v293_v4 = vmul.f32 %v1199_v26, %v1199_v26  ;;  %v257_v10 = vrot.slane %v256_v0, 4 }
 0x10d   :  { %v319_v50 = vrot.slane %v318_v42, 1  ;;  %v1223_v5 = vpop.f32.mrf.mxu0  ;;  %v337_v9 = vadd.f32 %v336_v62, %v335_v55  ;;  %v1227_v11 = vmul.f32 0.0625, %v306_v57  ;;  %v255_v12 = vadd.f32 %v254_v58, %v253_v38 }
 0x10e   :  { %v1225_v6 = vmul.f32 0.0625, %v248_v53  ;;  %v267_v7 = vadd.f32 %v266_v61, %v265_v54  ;;  %v326_v13 = vrot.slane %v325_v59, 1  ;;  %v328_v15 = vadd.f32 %v293_v4, %v292_v3 }
 0x10f   :  { %v320_v2 = vadd.f32 %v319_v50, %v318_v42  ;;  %v338_v17 = vrot.slane %v337_v9, 2  ;;  %v258_v18 = vadd.f32 %v257_v10, %v256_v0  ;;  %v277_v19 = vadd.f32 %v1223_v5, %v1203_v32  ;;  %v1237_v31 = vpop.f32.mrf.mxu0 }
 0x110   :  { %v268_v16 = vrot.slane %v267_v7, 1  ;;  %v329_v22 = vrot.slane %v328_v15, 4  ;;  %v298_v23 = vmul.f32 %v1203_v32, %v1203_v32  ;;  %v299_v24 = vmul.f32 %v1223_v5, %v1223_v5 }
 0x111   :  { %v366_v21 = vmul.f32 0.0625, %v320_v2  ;;  %v374_v25 = vmul.f32 %v1225_v6, %v1225_v6  ;;  %v339_v27 = vadd.f32 %v338_v17, %v337_v9  ;;  %v259_v28 = vrot.slane %v258_v18, 2 }
 0x112   :  { %v278_v30 = vrot.slane %v277_v19, 4  ;;  %v372_v33 = vmul.f32 %v1215_v60, %v1215_v60  ;;  %v327_v37 = vadd.f32 %v326_v13, %v325_v59  ;;  %v330_v38 = vadd.f32 %v329_v22, %v328_v15 }
 0x113   :  { %v349_v39 = vadd.f32 %v299_v24, %v298_v23  ;;  %v1241_v40 = vmul.f32 0.0625, %v255_v12  ;;  %v269_v42 = vadd.f32 %v268_v16, %v267_v7  ;;  %v260_v43 = vadd.f32 %v259_v28, %v258_v18 }
 0x114   :  { %v279_v44 = vadd.f32 %v278_v30, %v277_v19  ;;  %v340_v45 = vrot.slane %v339_v27, 1  ;;  %v331_v47 = vrot.slane %v330_v38, 2  ;;  %v270_v49 = vadd.f32 %v1237_v31, %v1213_v52 }
 0x115   :  { %v350_v48 = vrot.slane %v349_v39, 4  ;;  %v389_v50 = vmax.f32 %v381_v1, 0.0  ;;  %v382_v53 = vsub.f32 %v366_v21, %v374_v25  ;;  %v261_v54 = vrot.slane %v260_v43, 1 }
 0x116   :  { %v280_v55 = vrot.slane %v279_v44, 2  ;;  %v367_v57 = vmul.f32 0.0625, %v327_v37  ;;  %v332_v58 = vadd.f32 %v331_v47, %v330_v38  ;;  %v271_v61 = vrot.slane %v270_v49, 4 }
 0x117   :  { %v351_v59 = vadd.f32 %v350_v48, %v349_v39  ;;  %v375_v62 = vmul.f32 %v1241_v40, %v1241_v40  ;;  %v262_v0 = vadd.f32 %v261_v54, %v260_v43  ;;  %v297_v3 = vmul.f32 %v1237_v31, %v1237_v31 }
 0x118   :  { %v281_v2 = vadd.f32 %v280_v55, %v279_v44  ;;  %v341_v4 = vadd.f32 %v340_v45, %v339_v27  ;;  %v1249_v7 = vmul.f32 0.0625, %v269_v42  ;;  %v333_v9 = vrot.slane %v332_v58, 1 }
 0x119   :  { %v352_v1 = vrot.slane %v351_v59, 2  ;;  %v380_v10 = vsub.f32 %v1227_v11, %v372_v33  ;;  %v390_v12 = vmax.f32 %v382_v53, 0.0  ;;  %v296_v13 = vmul.f32 %v1213_v52, %v1213_v52 }
 0x11a   :  { %v272_v15 = vadd.f32 %v271_v61, %v270_v49  ;;  %v334_v16 = vadd.f32 %v333_v9, %v332_v58  ;;  %v1254_v17 = vmul.f32 0.0625, %v262_v0  ;;  %v282_v18 = vrot.slane %v281_v2, 1 }
 0x11b   :  { %v353_v19 = vadd.f32 %v352_v1, %v351_v59  ;;  %v397_v21 = vadd.f32 1e-05, %v389_v50  ;;  %v383_v22 = vsub.f32 %v367_v57, %v375_v62  ;;  %v342_v23 = vadd.f32 %v297_v3, %v296_v13 }
 0x11c   :  { %v369_v24 = vmul.f32 0.0625, %v341_v4  ;;  %v377_v25 = vmul.f32 %v1249_v7, %v1249_v7  ;;  %v368_v27 = vmul.f32 0.0625, %v334_v16  ;;  %v376_v11 = vmul.f32 %v1254_v17, %v1254_v17 }
 0x11d   :  { %v283_v28 = vadd.f32 %v282_v18, %v281_v2  ;;  %v354_v30 = vrot.slane %v353_v19, 1  ;;  %v273_v33 = vrot.slane %v272_v15, 2  ;;  %v388_v37 = vmax.f32 %v380_v10, 0.0 }
 0x11e   :  { %v398_v38 = vadd.f32 1e-05, %v390_v12  ;;  %v384_v39 = vsub.f32 %v368_v27, %v376_v11  ;;  %v343_v45 = vrot.slane %v342_v23, 4  ;;  %987 = vrsqrt.f32 %v397_v21 }
 0x11f   :  { %v355_v42 = vadd.f32 %v354_v30, %v353_v19  ;;  %v1260_v43 = vmul.f32 0.0625, %v283_v28  ;;  %v274_v44 = vadd.f32 %v273_v33, %v272_v15  ;;  %v391_v47 = vmax.f32 %v383_v22, 0.0  ;;  %v863_v22 = vld [vmem:[%s1326_s2] ss:$0 sm:$0xff] }
 0x120   :  { %v385_v48 = vsub.f32 %v369_v24, %v377_v25  ;;  %v392_v49 = vmax.f32 %v384_v39, 0.0  ;;  %v344_v55 = vadd.f32 %v343_v45, %v342_v23  ;;  %v396_v57 = vadd.f32 1e-05, %v388_v37 }
 0x121   :  { %v371_v50 = vmul.f32 0.0625, %v355_v42  ;;  %v379_v53 = vmul.f32 %v1260_v43, %v1260_v43  ;;  %v275_v54 = vrot.slane %v274_v44, 1  ;;  %989 = vrsqrt.f32 %v398_v38 }
 0x122   :  { %v400_v58 = vadd.f32 1e-05, %v392_v49  ;;  %v345_v62 = vrot.slane %v344_v55, 2  ;;  %v399_v0 = vadd.f32 1e-05, %v391_v47  ;;  %v393_v2 = vmax.f32 %v385_v48, 0.0 }
 0x123   :  { %v387_v59 = vsub.f32 %v371_v50, %v379_v53  ;;  %v276_v61 = vadd.f32 %v275_v54, %v274_v44  ;;  %991 = vrsqrt.f32 %v396_v57  ;;  %v473_v47 = vlaneseq }
 0x124   :  { %v346_v3 = vadd.f32 %v345_v62, %v344_v55  ;;  %993 = vrsqrt.f32 %v400_v58  ;;  %v401_v10 = vadd.f32 1e-05, %v393_v2 }
 0x125   :  { %v395_v4 = vmax.f32 %v387_v59, 0.0  ;;  %v362_v9 = vmul.f32 0.0625, %v276_v61  ;;  %995 = vrsqrt.f32 %v399_v0  ;;  %v1096_v61 = vmov 1966171168  }
 0x126   :  { %v347_v1 = vrot.slane %v346_v3, 1  ;;  %997 = vrsqrt.f32 %v401_v10  ;;  %v524_v62 = vunpack.c.l.s4 %v1096_v61 }
 0x127   :  { %v378_v13 = vmul.f32 %v362_v9, %v362_v9  ;;  %v403_v15 = vadd.f32 1e-05, %v395_v4 }
 0x128   :  { %v348_v12 = vadd.f32 %v347_v1, %v346_v3 }
 0x129   :  { %999 = vrsqrt.f32 %v403_v15 }
 0x12a   :  { %v370_v16 = vmul.f32 0.0625, %v348_v12  ;;  %v525_v12 = vunpack.c.0.s8 %v524_v62 }
 0x12b   :  { %v988_v18 = vpop.eup %987 }
 0x12c   :  { %v386_v19 = vsub.f32 %v370_v16, %v378_v13  ;;  %v420_v25 = vmul.f32 %v988_v18, %v863_v22 }
 0x12e   :  { %v990_v21 = vpop.eup %989  ;;  %v394_v23 = vmax.f32 %v386_v19, 0.0  ;;  %v429_v33 = vmul.f32 %v420_v25, %v1201_v29  ;;  %v474_v29 = vshrl.u32 %v473_v47, 7 }
 0x12f   :  { %v421_v11 = vmul.f32 %v990_v21, %v863_v22 }
 0x130   :  { %v402_v24 = vadd.f32 1e-05, %v394_v23  ;;  %v992_v27 = vpop.eup %991  ;;  %v450_v45 = vrot.slane %v429_v33, 7 }
 0x131   :  { %v994_v28 = vpop.eup %993  ;;  %v419_v37 = vmul.f32 %v992_v27, %v863_v22  ;;  %v430_v38 = vmul.f32 %v421_v11, %v1225_v6 }
 0x132   :  { %1001 = vrsqrt.f32 %v402_v24  ;;  %v996_v30 = vpop.eup %995  ;;  %v423_v39 = vmul.f32 %v994_v28, %v863_v22 }
 0x133   :  { %v422_v42 = vmul.f32 %v996_v30, %v863_v22  ;;  %v998_v44 = vpop.eup %997  ;;  %v428_v48 = vmul.f32 %v419_v37, %v1215_v60  ;;  %v453_v50 = vrot.slane %v430_v38, 6 }
 0x134   :  { %v432_v53 = vmul.f32 %v423_v39, %v1254_v17  ;;  %v424_v55 = vmul.f32 %v998_v44, %v863_v22  ;;  %v1275_v17 = vsub.s32 0, %v474_v29 }
 0x135   :  { %v431_v54 = vmul.f32 %v422_v42, %v1241_v40  ;;  %v452_v57 = vsel %vm451_vm1, %v450_v45, %v428_v48 }
 0x136   :  { %v1000_v49 = vpop.eup %999  ;;  %v455_v6 = vsel %vm454_vm2, %v453_v50, %v452_v57  ;;  %v459_v59 = vrot.slane %v432_v53, 4  ;;  %v433_v60 = vmul.f32 %v424_v55, %v1249_v7  ;;  %v864_v7 = vld [vmem:[%s1327_s3] ss:$0 sm:$0xff]  ;;  %v480_v19 = vrot.slane %v420_v25, %v1275_v17 }
 0x137   :  { %v426_v58 = vmul.f32 %v1000_v49, %v863_v22  ;;  %v456_v2 = vrot.slane %v431_v54, 5  ;;  %v484_v27 = vrot.slane %v421_v11, %v1275_v17  ;;  %v496_v28 = vrot.slane %v424_v55, %v1275_v17 }
 0x138   :  { %v462_v13 = vrot.slane %v433_v60, 3  ;;  %v507_v30 = vmul.f32 %v1153_v34, %v480_v19  ;;  %v508_v33 = vmul.f32 %v1157_v36, %v480_v19 }
 0x139   :  { %v458_v40 = vsel %vm457_vm3, %v456_v2, %v455_v6  ;;  %v435_v4 = vmul.f32 %v426_v58, %v1260_v43  ;;  %v476_v43 = vrot.slane %v419_v37, %v1275_v17  ;;  %v504_v47 = vrot.slane %v426_v58, %v1275_v17 }
 0x13a   :  { %v461_v1 = vsel %vm460_vm4, %v459_v59, %v458_v40  ;;  %v510_v34 = vmul.f32 %v484_v27, %v1185_v63  ;;  %v515_v36 = vmul.f32 %v1193_v8, %v496_v28  ;;  %v509_v53 = vmul.f32 %v484_v27, %v1175_v51 }
 0x13b   :  { %v468_v16 = vrot.slane %v435_v4, 1  ;;  %v464_v18 = vsel %vm463_vm5, %v462_v13, %v461_v1  ;;  %v505_v25 = vmul.f32 %v476_v43, %v1155_v35  ;;  %v506_v45 = vmul.f32 %v476_v43, %v1167_v41 }
 0x13f   :  { %v1002_v0 = vpop.eup %1001 }
 0x140   :  { %v1273_v3 = vmul.f32 %v1002_v0, %v863_v22  ;;  %v528_v22 = vsub.s32 %v525_v12, %v474_v29 }
 0x142   :  { %v434_v10 = vmul.f32 %v1273_v3, %v362_v9  ;;  %v488_v9 = vrot.slane %v422_v42, %v1275_v17  ;;  %v492_v42 = vrot.slane %v423_v39, %v1275_v17  ;;  %v516_v39 = vmul.f32 %v1197_v20, %v496_v28 }
 0x144   :  { %v465_v15 = vrot.slane %v434_v10, 2  ;;  %v511_v37 = vmul.f32 %v1173_v46, %v488_v9  ;;  %v512_v50 = vmul.f32 %v1177_v56, %v488_v9  ;;  %v513_v55 = vmul.f32 %v492_v42, %v1195_v14 }
 0x145   :  { %v514_v29 = vmul.f32 %v492_v42, %v1199_v26  ;;  %v519_v56 = vmul.f32 %v1203_v32, %v504_v47  ;;  %v500_v32 = vrot.slane %v1273_v3, %v1275_v17  ;;  %v520_v42 = vmul.f32 %v1223_v5, %v504_v47  ;;  %v865_v5 = vld [vmem:[%s1329_s5] ss:$0 sm:$0xff]  ;;  %s1097_s5 = smov [#allocation8]  }
 0x146   :  { %v467_v21 = vsel %vm466_vm6, %v465_v15, %v464_v18  ;;  %s840_s17 = sshll.u32 %s1097_s5, 4  ;;  %s841_s17 = int_to_ptr.vmem [resolvable:$true] %s840_s17 }
 0x147   :  { %v470_v23 = vsel %vm469_vm7, %v468_v16, %v467_v21  ;;  %s1063_s18 = scalar_lea.vmem %s841_s17, 2048  ;;  %p1068_p2 = scmp.lt.s32.totalorder %s841_s17, %s841_s17 }
 0x148   :  { %v472_v24 = vsub.f32 %v864_v7, %v470_v23  ;;  %p1064_p1 = scmp.ne.s32.totalorder %s841_s17, %s1063_s18  ;;  %p1069_p3 = scmp.lt.s32.totalorder %s1063_s18, %s1063_s18 }
 0x14a   :  { %v522_v38 = vcombine.high %v472_v24, %v472_v24  ;;  %v529_v44 = vrot.slane %v472_v24, %v528_v22  ;;  %p1070_p4 = por %p1069_p3, %p1068_p2 }
 0x14c   :  { %v536_v48 = vrot.slane %v522_v38, %v528_v22  ;;  %v537_v11 = vcombine.high %v529_v44, %v529_v44  ;;  %v545_v49 = vrot.slane %v529_v44, %v528_v22  ;;  %p1071_p5 = pnand %p1070_p4, %p1064_p1 }
 0x14e   :  { %v552_v35 = vrot.slane %v536_v48, %v528_v22  ;;  %v559_v54 = vrot.slane %v537_v11, %v528_v22  ;;  %v574_v41 = vrot.slane %v545_v49, %v1275_v17  ;;  %v567_v46 = vcombine.high %v545_v49, %v545_v49 }
 0x14f   :  { %v538_v57 = vcombine.high %v536_v48, %v536_v48 }
 0x150   :  { %v611_v58 = vadd.f32 %v574_v41, %v505_v25  ;;  %v612_v63 = vadd.f32 %v574_v41, %v506_v45  ;;  %v578_v8 = vrot.slane %v559_v54, %v1275_v17  ;;  %v568_v6 = vcombine.high %v552_v35, %v552_v35 }
 0x151   :  { %v582_v51 = vrot.slane %v567_v46, %v1275_v17  ;;  %v569_v59 = vcombine.high %v559_v54, %v559_v54  ;;  %v590_v61 = vrot.slane %v552_v35, %v1275_v17  ;;  %v566_v2 = vrot.slane %v538_v57, %v528_v22 }
 0x152   :  { %v627_v62 = vmax.f32 %v611_v58, 0.0  ;;  %v628_v0 = vmax.f32 %v612_v63, 0.0  ;;  %v613_v20 = vadd.f32 %v578_v8, %v507_v30  ;;  %v614_v14 = vadd.f32 %v578_v8, %v508_v33 }
 0x153   :  { %v615_v60 = vadd.f32 %v582_v51, %v509_v53  ;;  %v616_v26 = vadd.f32 %v582_v51, %v510_v34  ;;  %v586_v40 = vrot.slane %v569_v59, %v1275_v17  ;;  %v619_v10 = vadd.f32 %v590_v61, %v513_v55 }
 0x154   :  { %v643_v4 = vpack.c.bf16 %v628_v0, %v627_v62  ;;  %v629_v1 = vmax.f32 %v613_v20, 0.0  ;;  %v630_v12 = vmax.f32 %v614_v14, 0.0  ;;  %v620_v18 = vadd.f32 %v590_v61, %v514_v29 }
 0x155   :  { %v631_v13 = vmax.f32 %v615_v60, 0.0  ;;  %v632_v15 = vmax.f32 %v616_v26, 0.0  ;;  %v617_v16 = vadd.f32 %v586_v40, %v511_v37  ;;  %v618_v7 = vadd.f32 %v586_v40, %v512_v50 }
 0x156   :  { %936 = vmatprep.mubr.bf16.mxu0 %v643_v4  ;;  %v635_v19 = vmax.f32 %v619_v10, 0.0  ;;  %v594_v21 = vrot.slane %v566_v2, %v1275_v17  ;;  %v598_v22 = vrot.slane %v568_v6, %v1275_v17  ;;  %v644_v43 = vpack.c.bf16 %v630_v12, %v629_v1 }
 0x157   :  { %v645_v9 = vpack.c.bf16 %v632_v15, %v631_v13  ;;  %v633_v23 = vmax.f32 %v617_v16, 0.0  ;;  %v634_v24 = vmax.f32 %v618_v7, 0.0  ;;  %v636_v3 = vmax.f32 %v620_v18, 0.0 }
 0x158   :  { %v621_v27 = vadd.f32 %v594_v21, %v515_v36  ;;  %v622_v28 = vadd.f32 %v594_v21, %v516_v39  ;;  %v517_v30 = vmul.f32 %v500_v32, %v1213_v52  ;;  %v518_v33 = vmul.f32 %v500_v32, %v1237_v31  ;;  %937 = vmatmul.mubr.bf16.vlgmr.msra.gmra.mxu0 %v644_v43 }
 0x159   :  { %940 = vmatprep.mubr.bf16.mxu1 %v645_v9  ;;  %v570_v38 = vcombine.high %v566_v2, %v566_v2  ;;  %v646_v44 = vpack.c.bf16 %v634_v24, %v633_v23  ;;  %v647_v25 = vpack.c.bf16 %v636_v3, %v635_v19 }
 0x15a   :  { %v637_v45 = vmax.f32 %v621_v27, 0.0  ;;  %v638_v37 = vmax.f32 %v622_v28, 0.0  ;;  %v624_v48 = vadd.f32 %v598_v22, %v518_v33  ;;  %v623_v11 = vadd.f32 %v598_v22, %v517_v30 }
 0x15b   :  { %v602_v49 = vrot.slane %v570_v38, %v1275_v17  ;;  %941 = vmatmul.mubr.bf16.vlgmr.msra.gmra.mxu1 %v646_v44 }
 0x15c   :  { %v648_v50 = vpack.c.bf16 %v638_v37, %v637_v45  ;;  %944 = vmatprep.mubr.bf16.mxu1 %v647_v25  ;;  %v639_v36 = vmax.f32 %v623_v11, 0.0  ;;  %v640_v31 = vmax.f32 %v624_v48, 0.0 }
 0x15d   :  { %v625_v34 = vadd.f32 %v602_v49, %v519_v56  ;;  %v626_v52 = vadd.f32 %v602_v49, %v520_v42 }
 0x15e   :  { %v649_v41 = vpack.c.bf16 %v640_v31, %v639_v36 }
 0x15f   :  { %v641_v53 = vmax.f32 %v625_v34, 0.0  ;;  %v642_v35 = vmax.f32 %v626_v52, 0.0 }
 0x161   :  { %v650_v54 = vpack.c.bf16 %v642_v35, %v641_v53 }
 0x163   :  { %945 = vmatmul.mubr.bf16.gmra.mxu1 %v648_v50 }
 0x164   :  { %948 = vmatprep.mubr.bf16.mxu1 %v649_v41 }
 0x16b   :  { %949 = vmatmul.mubr.bf16.gmra.mxu1 %v650_v54 }
 0x218   :  { %v938_v47 = vpop.f32.mrf.mxu0 }
 0x219   :  { %v765_v17 = vadd.f32 %v938_v47, %v865_v5 }
 0x21a   :  { %v756_v46 = vpop.f32.mrf.mxu0 }
 0x21b   :  { %821 = vst [vmem:[#allocation8 + $0x10] sm:$0xff] %v765_v17  ;;  %v757_v39 = vadd.f32 %v865_v5, %v756_v46  ;;  %v942_v55 = vpop.f32.mrf.mxu1 }
 0x21c   :  { %v781_v29 = vadd.f32 %v942_v55, %v865_v5  ;;  %v939_v57 = vpop.f32.mrf.mxu0 }
 0x21d   :  { %819 = vst [vmem:[#allocation8] sm:$0xff] %v757_v39  ;;  %v768_v56 = vadd.f32 %v939_v57, %v865_v5  ;;  %v772_v58 = vpop.f32.mrf.mxu1 }
 0x21e   :  { %825 = vst [vmem:[#allocation8 + $0x30] sm:$0xff] %v781_v29  ;;  %v773_v63 = vadd.f32 %v865_v5, %v772_v58  ;;  %v759_v8 = vpop.f32.mrf.mxu0 }
 0x21f   :  { %822 = vst [vmem:[#allocation8 + $0x18] sm:$0xff] %v768_v56  ;;  %v760_v6 = vadd.f32 %v865_v5, %v759_v8  ;;  %v943_v51 = vpop.f32.mrf.mxu1 }
 0x220   :  { %823 = vst [vmem:[#allocation8 + $0x20] sm:$0xff] %v773_v63  ;;  %v784_v59 = vadd.f32 %v943_v51, %v865_v5 }
 0x221   :  { %820 = vst [vmem:[#allocation8 + $0x8] sm:$0xff] %v760_v6  ;;  %v775_v61 = vpop.f32.mrf.mxu1 }
 0x222   :  { %826 = vst [vmem:[#allocation8 + $0x38] sm:$0xff] %v784_v59  ;;  %v776_v62 = vadd.f32 %v865_v5, %v775_v61 }
 0x223   :  { %v946_v0 = vpop.f32.mrf.mxu1 }
 0x224   :  { %824 = vst [vmem:[#allocation8 + $0x28] sm:$0xff] %v776_v62  ;;  %v797_v20 = vadd.f32 %v946_v0, %v865_v5 }
 0x225   :  { %v788_v2 = vpop.f32.mrf.mxu1 }
 0x226   :  { %829 = vst [vmem:[#allocation8 + $0x50] sm:$0xff] %v797_v20  ;;  %v789_v14 = vadd.f32 %v865_v5, %v788_v2 }
 0x227   :  { %v947_v60 = vpop.f32.mrf.mxu1 }
 0x228   :  { %827 = vst [vmem:[#allocation8 + $0x40] sm:$0xff] %v789_v14  ;;  %v800_v26 = vadd.f32 %v947_v60, %v865_v5 }
 0x229   :  { %v791_v40 = vpop.f32.mrf.mxu1 }
 0x22a   :  { %830 = vst [vmem:[#allocation8 + $0x58] sm:$0xff] %v800_v26  ;;  %v792_v32 = vadd.f32 %v865_v5, %v791_v40 }
 0x22b   :  { %v950_v4 = vpop.f32.mrf.mxu1 }
 0x22c   :  { %828 = vst [vmem:[#allocation8 + $0x48] sm:$0xff] %v792_v32  ;;  %v813_v1 = vadd.f32 %v950_v4, %v865_v5 }
 0x22d   :  { %v804_v10 = vpop.f32.mrf.mxu1 }
 0x22e   :  { %833 = vst [vmem:[#allocation8 + $0x70] sm:$0xff] %v813_v1  ;;  %v805_v12 = vadd.f32 %v865_v5, %v804_v10 }
 0x22f   :  { %v951_v13 = vpop.f32.mrf.mxu1 }
 0x230   :  { %831 = vst [vmem:[#allocation8 + $0x60] sm:$0xff] %v805_v12  ;;  %v816_v15 = vadd.f32 %v951_v13, %v865_v5 }
 0x231   :  { %v807_v16 = vpop.f32.mrf.mxu1 }
 0x232   :  { %834 = vst [vmem:[#allocation8 + $0x78] sm:$0xff] %v816_v15  ;;  %v808_v7 = vadd.f32 %v865_v5, %v807_v16 }
 0x234   :  { %832 = vst [vmem:[#allocation8 + $0x68] sm:$0xff] %v808_v7 }
 0x235   :  { %1074 = shalt.err (!%p1071_p5)
}
 0x236   :  { %846 = dma.vmem_to_hbm [thread:$0]  %s841_s17, 2048, %s1330_s6, [#allocation4], %s1093_s7, %s1093_s7, %s1094_s8  }
 0x237   :  { %1087 = dma.done.wait [#allocation4], 2048  }
 0x238   :  { %1088 = vsyncadd [#allocation4], 4294965248 }
 0x239   :  { %850 = vsyncpa [#allocation3], 1 }
 0x23a   :  { %851 = vsyncpa [#allocation6], 1 }
 0x23b   :  { %852 = vsyncpa [#allocation4], 1 }

// kernel: tpu_custom_call.1
= control target key start
LH: loop header
LB: loop body
LE: loop exit
PB: predicated region body
PF: predicated region fallthrough
CT: control target
= control target key end

     0   :  { %11 = vsyncpa [#allocation3], 0  ;;  %s1324_s0 = inlined_call_operand.hbm [shape: f32[8,16,32], index: 0, kind: input, shape index: {}]   ;;  %s1325_s1 = inlined_call_operand.hbm [shape: bf16[32,128], index: 1, kind: input, shape index: {}]   ;;  %s1326_s2 = inlined_call_operand.vmem [shape: f32[1,128], index: 2, kind: input, shape index: {}]   ;;  %s1327_s3 = inlined_call_operand.vmem [shape: f32[1,128], index: 3, kind: input, shape index: {}]   ;;  %s1328_s4 = inlined_call_operand.hbm [shape: bf16[128,128], index: 4, kind: input, shape index: {}]   ;;  %s1329_s5 = inlined_call_operand.vmem [shape: f32[1,128], index: 5, kind: input, shape index: {}]   ;;  %s1330_s6 = inlined_call_operand.hbm [shape: f32[8,16,128], index: 6, kind: output, shape index: {}]  }
   0x1   :  { %12 = vsyncpa [#allocation6], 0 }
   0x2   :  { %13 = vsyncpa [#allocation4], 0  ;;  %s1089_s21 = smov [#allocation5]  }
   0x3   :  { %s31_s22 = sshll.u32 %s1089_s21, 4  ;;  %s32_s22 = int_to_ptr.vmem [resolvable:$true] %s31_s22 }
   0x4   :  { %s1011_s23 = scalar_lea.vmem %s32_s22, 256  ;;  %p1016_p1 = scmp.lt.s32.totalorder %s32_s22, %s32_s22 }
   0x5   :  { %p1012_p0 = scmp.ne.s32.totalorder %s32_s22, %s1011_s23  ;;  %p1017_p2 = scmp.lt.s32.totalorder %s1011_s23, %s1011_s23 }
   0x7   :  { %p1018_p3 = por %p1017_p2, %p1016_p1 }
   0x9   :  { %p1019_p4 = pnand %p1018_p3, %p1012_p0 }
   0xb   :  { %1022 = shalt.err (!%p1019_p4)
}
   0xc   :  { %s1090_s24 = smov 64   ;;  %s1091_s25 = smov 4  }
   0xd   :  { %37 = dma.hbm_to_vmem [thread:$0]  %s1325_s1, 256, %s32_s22, [#allocation6], %s1090_s24, %s1090_s24, %s1091_s25  }
   0xe   :  { %s1092_s28 = smov [#allocation2]  }
   0xf   :  { %s19_s29 = sshll.u32 %s1092_s28, 4  ;;  %s20_s29 = int_to_ptr.vmem [resolvable:$true] %s19_s29 }
  0x10   :  { %s1031_s30 = scalar_lea.vmem %s20_s29, 2048  ;;  %p1036_p6 = scmp.lt.s32.totalorder %s20_s29, %s20_s29 }
  0x11   :  { %p1032_p5 = scmp.ne.s32.totalorder %s20_s29, %s1031_s30  ;;  %p1037_p7 = scmp.lt.s32.totalorder %s1031_s30, %s1031_s30 }
  0x13   :  { %p1038_p8 = por %p1037_p7, %p1036_p6 }
  0x15   :  { %p1039_p9 = pnand %p1038_p8, %p1032_p5 }
  0x17   :  { %1042 = shalt.err (!%p1039_p9)
}
  0x18   :  { %s1093_s7 = smov 128   ;;  %s1094_s8 = smov 8  }
  0x19   :  { %25 = dma.hbm_to_vmem [thread:$0]  %s1324_s0, 2048, %s20_s29, [#allocation3], %s1093_s7, %s1093_s7, %s1094_s8  }
  0x1a   :  { %s1095_s1 = smov [#allocation7]  }
  0x1b   :  { %s47_s11 = sshll.u32 %s1095_s1, 4  ;;  %s48_s11 = int_to_ptr.vmem [resolvable:$true] %s47_s11 }
  0x1c   :  { %s1051_s12 = scalar_lea.vmem %s48_s11, 1024  ;;  %p1056_p11 = scmp.lt.s32.totalorder %s48_s11, %s48_s11 }
  0x1d   :  { %p1052_p10 = scmp.ne.s32.totalorder %s48_s11, %s1051_s12  ;;  %p1057_p12 = scmp.lt.s32.totalorder %s1051_s12, %s1051_s12 }
  0x1f   :  { %p1058_p13 = por %p1057_p12, %p1056_p11 }
  0x21   :  { %p1059_p0 = pnand %p1058_p13, %p1052_p10 }
  0x23   :  { %1062 = shalt.err (!%p1059_p0)
}
  0x24   :  { %53 = dma.hbm_to_vmem [thread:$0]  %s1328_s4, 1024, %s48_s11, [#allocation6], %s1090_s24, %s1090_s24, %s1091_s25  }
  0x25   :  { %1083 = dma.done.wait [#allocation3], 2048  }
  0x26   :  { %1084 = vsyncadd [#allocation3], 4294965248 }
  0x27   :  { %1085 = dma.done.wait [#allocation6], 1280  }
  0x28   :  { %1086 = vsyncadd [#allocation6], 4294966016  ;;  %v977_v0 = vld [vmem:[#allocation5 + $0x8] sm:$0xff]   ;;  %v978_v1 = vld [vmem:[#allocation5] sm:$0xff]   ;;  %vm106_vm0 = vcmask 261120   ;;  %vm451_vm1 = vcmask 1041409  }
  0x29   :  { %900 = vmatprep.subr.bf16.mxu0 %v977_v0  ;;  %v66_v2 = vld [vmem:[#allocation2] sm:$0xff]  ;;  %v67_v3 = vld [vmem:[#allocation2 + $0x8] sm:$0xff]  ;;  %v68_v5 = vld [vmem:[#allocation2 + $0x10] sm:$0xff]  ;;  %vm454_vm2 = vcmask 1042434   ;;  %vm457_vm3 = vcmask 1043459   ;;  %vm460_vm4 = vcmask 1044484  }
  0x2a   :  { %901 = vmatpush3.bf16.msra.mxu0 %v977_v0  ;;  %v82_v4 = vpack.c.bf16 %v67_v3, %v66_v2  ;;  %v69_v6 = vld [vmem:[#allocation2 + $0x18] sm:$0xff]  ;;  %v70_v7 = vld [vmem:[#allocation2 + $0x20] sm:$0xff]  ;;  %v71_v8 = vld [vmem:[#allocation2 + $0x28] sm:$0xff]  ;;  %vm463_vm5 = vcmask 1045509   ;;  %vm466_vm6 = vcmask 1046534   ;;  %vm469_vm7 = vcmask 1047559  }
  0x2b   :  { %902 = vmatprep.subr.bf16.mxu0 %v978_v1  ;;  %v83_v9 = vpack.c.bf16 %v69_v6, %v68_v5  ;;  %v84_v10 = vpack.c.bf16 %v71_v8, %v70_v7  ;;  %v72_v11 = vld [vmem:[#allocation2 + $0x30] sm:$0xff]  ;;  %v73_v12 = vld [vmem:[#allocation2 + $0x38] sm:$0xff]  ;;  %v74_v13 = vld [vmem:[#allocation2 + $0x40] sm:$0xff] }
  0x2c   :  { %904 = vmatprep.mubr.msk.bf16.mxu0 %vm106_vm0, %v82_v4  ;;  %v75_v14 = vld [vmem:[#allocation2 + $0x48] sm:$0xff]  ;;  %v85_v15 = vpack.c.bf16 %v73_v12, %v72_v11  ;;  %v76_v17 = vld [vmem:[#allocation2 + $0x50] sm:$0xff]  ;;  %v77_v18 = vld [vmem:[#allocation2 + $0x58] sm:$0xff] }
  0x2d   :  { %v86_v16 = vpack.c.bf16 %v75_v14, %v74_v13  ;;  %v78_v19 = vld [vmem:[#allocation2 + $0x60] sm:$0xff]  ;;  %v79_v20 = vld [vmem:[#allocation2 + $0x68] sm:$0xff]  ;;  %v87_v21 = vpack.c.bf16 %v77_v18, %v76_v17  ;;  %v80_v23 = vld [vmem:[#allocation2 + $0x70] sm:$0xff] }
  0x2e   :  { %903 = vmatpush3.bf16.msra.mxu0 %v978_v1  ;;  %v88_v22 = vpack.c.bf16 %v79_v20, %v78_v19  ;;  %v81_v24 = vld [vmem:[#allocation2 + $0x78] sm:$0xff]  ;;  %v979_v26 = vld [vmem:[#allocation7 + $0x38] sm:$0xff]   ;;  %v980_v27 = vld [vmem:[#allocation7 + $0x30] sm:$0xff]  }
  0x2f   :  { %v89_v25 = vpack.c.bf16 %v81_v24, %v80_v23  ;;  %920 = vmatprep.subr.bf16.mxu0 %v979_v26  ;;  %952 = vmatprep.subr.bf16.mxu1 %v979_v26  ;;  %v981_v28 = vld [vmem:[#allocation7 + $0x28] sm:$0xff]   ;;  %v982_v29 = vld [vmem:[#allocation7 + $0x20] sm:$0xff]   ;;  %v983_v30 = vld [vmem:[#allocation7 + $0x18] sm:$0xff]  }
  0x30   :  { %960 = vmatpush3.bf16.msra.mxu1 %v979_v26  ;;  %v984_v31 = vld [vmem:[#allocation7 + $0x10] sm:$0xff]   ;;  %v985_v32 = vld [vmem:[#allocation7 + $0x8] sm:$0xff]   ;;  %v986_v33 = vld [vmem:[#allocation7] sm:$0xff]  }
  0x31   :  { %905 = vmatmul.mubr.msk.bf16.vlgmr.msra.gmra.mxu0 %vm106_vm0, %v83_v9  ;;  %953 = vmatprep.subr.bf16.mxu1 %v980_v27 }
  0x32   :  { %908 = vmatprep.mubr.msk.bf16.mxu0 %vm106_vm0, %v84_v10  ;;  %921 = vmatpush3.bf16.msra.mxu0 %v979_v26 }
  0x33   :  { %922 = vmatprep.subr.bf16.mxu0 %v980_v27 }
  0x34   :  { %961 = vmatpush3.bf16.msra.mxu1 %v980_v27 }
  0x35   :  { %954 = vmatprep.subr.bf16.mxu1 %v981_v28 }
  0x36   :  { %923 = vmatpush3.bf16.msra.mxu0 %v980_v27 }
  0x37   :  { %924 = vmatprep.subr.bf16.mxu0 %v981_v28 }
  0x38   :  { %962 = vmatpush3.bf16.msra.mxu1 %v981_v28 }
  0x39   :  { %909 = vmatmul.mubr.msk.bf16.gmra.mxu0 %vm106_vm0, %v85_v15  ;;  %955 = vmatprep.subr.bf16.mxu1 %v982_v29 }
  0x3a   :  { %912 = vmatprep.mubr.msk.bf16.mxu0 %vm106_vm0, %v86_v16  ;;  %925 = vmatpush3.bf16.msra.mxu0 %v981_v28 }
  0x3b   :  { %926 = vmatprep.subr.bf16.mxu0 %v982_v29 }
  0x3c   :  { %963 = vmatpush3.bf16.msra.mxu1 %v982_v29 }
  0x3d   :  { %956 = vmatprep.subr.bf16.mxu1 %v983_v30 }
  0x3e   :  { %927 = vmatpush3.bf16.msra.mxu0 %v982_v29 }
  0x3f   :  { %928 = vmatprep.subr.bf16.mxu0 %v983_v30 }
  0x40   :  { %964 = vmatpush3.bf16.msra.mxu1 %v983_v30 }
  0x41   :  { %913 = vmatmul.mubr.msk.bf16.gmra.mxu0 %vm106_vm0, %v87_v21  ;;  %957 = vmatprep.subr.bf16.mxu1 %v984_v31 }
  0x42   :  { %916 = vmatprep.mubr.msk.bf16.mxu0 %vm106_vm0, %v88_v22  ;;  %929 = vmatpush3.bf16.msra.mxu0 %v983_v30 }
  0x43   :  { %930 = vmatprep.subr.bf16.mxu0 %v984_v31 }
  0x44   :  { %965 = vmatpush3.bf16.msra.mxu1 %v984_v31 }
  0x45   :  { %958 = vmatprep.subr.bf16.mxu1 %v985_v32 }
  0x46   :  { %931 = vmatpush3.bf16.msra.mxu0 %v984_v31 }
  0x47   :  { %932 = vmatprep.subr.bf16.mxu0 %v985_v32 }
  0x48   :  { %966 = vmatpush3.bf16.msra.mxu1 %v985_v32 }
  0x49   :  { %917 = vmatmul.mubr.msk.bf16.gmra.mxu0 %vm106_vm0, %v89_v25  ;;  %959 = vmatprep.subr.bf16.mxu1 %v986_v33 }
  0x4a   :  { %933 = vmatpush3.bf16.msra.mxu0 %v985_v32 }
  0x4b   :  { %934 = vmatprep.subr.bf16.mxu0 %v986_v33 }
  0x4c   :  { %967 = vmatpush3.bf16.msra.mxu1 %v986_v33 }
  0x4e   :  { %935 = vmatpush3.bf16.msra.mxu0 %v986_v33 }
  0xf1   :  { %v1153_v34 = vpop.f32.mrf.mxu0 }
  0xf2   :  { %v286_v37 = vmul.f32 %v1153_v34, %v1153_v34 }
  0xf3   :  { %v1155_v35 = vpop.f32.mrf.mxu0 }
  0xf4   :  { %v284_v40 = vmul.f32 %v1155_v35, %v1155_v35 }
  0xf5   :  { %v1157_v36 = vpop.f32.mrf.mxu0 }
  0xf6   :  { %v235_v38 = vadd.f32 %v1157_v36, %v1153_v34  ;;  %v287_v39 = vmul.f32 %v1157_v36, %v1157_v36 }
  0xf7   :  { %v1167_v41 = vpop.f32.mrf.mxu0 }
  0xf8   :  { %v236_v42 = vrot.slane %v235_v38, 4  ;;  %v307_v43 = vadd.f32 %v287_v39, %v286_v37  ;;  %v228_v44 = vadd.f32 %v1167_v41, %v1155_v35  ;;  %v285_v45 = vmul.f32 %v1167_v41, %v1167_v41 }
  0xf9   :  { %v1173_v46 = vpop.f32.mrf.mxu0 }
  0xfa   :  { %v237_v47 = vadd.f32 %v236_v42, %v235_v38  ;;  %v308_v48 = vrot.slane %v307_v43, 4  ;;  %v229_v49 = vrot.slane %v228_v44, 4  ;;  %v300_v50 = vadd.f32 %v285_v45, %v284_v40 }
  0xfb   :  { %v1175_v51 = vpop.f32.mrf.mxu0  ;;  %v290_v60 = vmul.f32 %v1173_v46, %v1173_v46 }
  0xfc   :  { %v238_v52 = vrot.slane %v237_v47, 2  ;;  %v309_v53 = vadd.f32 %v308_v48, %v307_v43  ;;  %v230_v54 = vadd.f32 %v229_v49, %v228_v44  ;;  %v301_v55 = vrot.slane %v300_v50, 4 }
  0xfd   :  { %v1177_v56 = vpop.f32.mrf.mxu0  ;;  %v288_v3 = vmul.f32 %v1175_v51, %v1175_v51 }
  0xfe   :  { %v239_v57 = vadd.f32 %v238_v52, %v237_v47  ;;  %v310_v58 = vrot.slane %v309_v53, 2  ;;  %v302_v59 = vadd.f32 %v301_v55, %v300_v50  ;;  %v249_v61 = vadd.f32 %v1177_v56, %v1173_v46 }
  0xff   :  { %v291_v62 = vmul.f32 %v1177_v56, %v1177_v56  ;;  %v1185_v63 = vpop.f32.mrf.mxu0  ;;  %v231_v2 = vrot.slane %v230_v54, 2 }
 0x100   :  { %v240_v0 = vrot.slane %v239_v57, 1  ;;  %v311_v1 = vadd.f32 %v310_v58, %v309_v53  ;;  %v250_v4 = vrot.slane %v249_v61, 4  ;;  %v242_v6 = vadd.f32 %v1185_v63, %v1175_v51 }
 0x101   :  { %v321_v5 = vadd.f32 %v291_v62, %v290_v60  ;;  %v289_v7 = vmul.f32 %v1185_v63, %v1185_v63  ;;  %v1193_v8 = vpop.f32.mrf.mxu0  ;;  %v303_v9 = vrot.slane %v302_v59, 2  ;;  %v232_v15 = vadd.f32 %v231_v2, %v230_v54 }
 0x102   :  { %v251_v10 = vadd.f32 %v250_v4, %v249_v61  ;;  %v243_v12 = vrot.slane %v242_v6, 4  ;;  %v241_v16 = vadd.f32 %v240_v0, %v239_v57  ;;  %v312_v17 = vrot.slane %v311_v1, 1 }
 0x103   :  { %v322_v11 = vrot.slane %v321_v5, 4  ;;  %v314_v13 = vadd.f32 %v289_v7, %v288_v3  ;;  %v1195_v14 = vpop.f32.mrf.mxu0  ;;  %v304_v21 = vadd.f32 %v303_v9, %v302_v59  ;;  %v233_v27 = vrot.slane %v232_v15, 1 }
 0x104   :  { %v244_v18 = vadd.f32 %v243_v12, %v242_v6  ;;  %v252_v22 = vrot.slane %v251_v10, 2  ;;  %v313_v28 = vadd.f32 %v312_v17, %v311_v1  ;;  %v1201_v29 = vmul.f32 0.0625, %v241_v16 }
 0x105   :  { %v315_v19 = vrot.slane %v314_v13, 4  ;;  %v1197_v20 = vpop.f32.mrf.mxu0  ;;  %v323_v23 = vadd.f32 %v322_v11, %v321_v5  ;;  %v305_v33 = vrot.slane %v304_v21, 1  ;;  %v234_v43 = vadd.f32 %v233_v27, %v232_v15 }
 0x106   :  { %v245_v24 = vrot.slane %v244_v18, 2  ;;  %v263_v37 = vadd.f32 %v1197_v20, %v1193_v8  ;;  %v253_v38 = vadd.f32 %v252_v22, %v251_v10  ;;  %v294_v44 = vmul.f32 %v1193_v8, %v1193_v8 }
 0x107   :  { %v316_v25 = vadd.f32 %v315_v19, %v314_v13  ;;  %v1199_v26 = vpop.f32.mrf.mxu0  ;;  %v324_v39 = vrot.slane %v323_v23, 2  ;;  %v295_v47 = vmul.f32 %v1197_v20, %v1197_v20  ;;  %v365_v48 = vmul.f32 0.0625, %v313_v28 }
 0x108   :  { %v246_v30 = vadd.f32 %v245_v24, %v244_v18  ;;  %v264_v45 = vrot.slane %v263_v37, 4  ;;  %v373_v49 = vmul.f32 %v1201_v29, %v1201_v29  ;;  %v306_v57 = vadd.f32 %v305_v33, %v304_v21 }
 0x109   :  { %v317_v31 = vrot.slane %v316_v25, 2  ;;  %v1203_v32 = vpop.f32.mrf.mxu0  ;;  %v335_v55 = vadd.f32 %v295_v47, %v294_v44  ;;  %v254_v58 = vrot.slane %v253_v38, 1  ;;  %v325_v59 = vadd.f32 %v324_v39, %v323_v23 }
 0x10a   :  { %v247_v40 = vrot.slane %v246_v30, 1  ;;  %v265_v54 = vadd.f32 %v264_v45, %v263_v37  ;;  %v1215_v60 = vmul.f32 0.0625, %v234_v43  ;;  %v256_v0 = vadd.f32 %v1199_v26, %v1195_v14 }
 0x10b   :  { %v318_v42 = vadd.f32 %v317_v31, %v316_v25  ;;  %v1213_v52 = vpop.f32.mrf.mxu0  ;;  %v336_v62 = vrot.slane %v335_v55, 4  ;;  %v381_v1 = vsub.f32 %v365_v48, %v373_v49  ;;  %v292_v3 = vmul.f32 %v1195_v14, %v1195_v14 }
 0x10c   :  { %v248_v53 = vadd.f32 %v247_v40, %v246_v30  ;;  %v266_v61 = vrot.slane %v265_v54, 2  ;;  %v293_v4 = vmul.f32 %v1199_v26, %v1199_v26  ;;  %v257_v10 = vrot.slane %v256_v0, 4 }
 0x10d   :  { %v319_v50 = vrot.slane %v318_v42, 1  ;;  %v1223_v5 = vpop.f32.mrf.mxu0  ;;  %v337_v9 = vadd.f32 %v336_v62, %v335_v55  ;;  %v1227_v11 = vmul.f32 0.0625, %v306_v57  ;;  %v255_v12 = vadd.f32 %v254_v58, %v253_v38 }
 0x10e   :  { %v1225_v6 = vmul.f32 0.0625, %v248_v53  ;;  %v267_v7 = vadd.f32 %v266_v61, %v265_v54  ;;  %v326_v13 = vrot.slane %v325_v59, 1  ;;  %v328_v15 = vadd.f32 %v293_v4, %v292_v3 }
 0x10f   :  { %v320_v2 = vadd.f32 %v319_v50, %v318_v42  ;;  %v338_v17 = vrot.slane %v337_v9, 2  ;;  %v258_v18 = vadd.f32 %v257_v10, %v256_v0  ;;  %v277_v19 = vadd.f32 %v1223_v5, %v1203_v32  ;;  %v1237_v31 = vpop.f32.mrf.mxu0 }
 0x110   :  { %v268_v16 = vrot.slane %v267_v7, 1  ;;  %v329_v22 = vrot.slane %v328_v15, 4  ;;  %v298_v23 = vmul.f32 %v1203_v32, %v1203_v32  ;;  %v299_v24 = vmul.f32 %v1223_v5, %v1223_v5 }
 0x111   :  { %v366_v21 = vmul.f32 0.0625, %v320_v2  ;;  %v374_v25 = vmul.f32 %v1225_v6, %v1225_v6  ;;  %v339_v27 = vadd.f32 %v338_v17, %v337_v9  ;;  %v259_v28 = vrot.slane %v258_v18, 2 }
 0x112   :  { %v278_v30 = vrot.slane %v277_v19, 4  ;;  %v372_v33 = vmul.f32 %v1215_v60, %v1215_v60  ;;  %v327_v37 = vadd.f32 %v326_v13, %v325_v59  ;;  %v330_v38 = vadd.f32 %v329_v22, %v328_v15 }
 0x113   :  { %v349_v39 = vadd.f32 %v299_v24, %v298_v23  ;;  %v1241_v40 = vmul.f32 0.0625, %v255_v12  ;;  %v269_v42 = vadd.f32 %v268_v16, %v267_v7  ;;  %v260_v43 = vadd.f32 %v259_v28, %v258_v18 }
 0x114   :  { %v279_v44 = vadd.f32 %v278_v30, %v277_v19  ;;  %v340_v45 = vrot.slane %v339_v27, 1  ;;  %v331_v47 = vrot.slane %v330_v38, 2  ;;  %v270_v49 = vadd.f32 %v1237_v31, %v1213_v52 }
 0x115   :  { %v350_v48 = vrot.slane %v349_v39, 4  ;;  %v389_v50 = vmax.f32 %v381_v1, 0.0  ;;  %v382_v53 = vsub.f32 %v366_v21, %v374_v25  ;;  %v261_v54 = vrot.slane %v260_v43, 1 }
 0x116   :  { %v280_v55 = vrot.slane %v279_v44, 2  ;;  %v367_v57 = vmul.f32 0.0625, %v327_v37  ;;  %v332_v58 = vadd.f32 %v331_v47, %v330_v38  ;;  %v271_v61 = vrot.slane %v270_v49, 4 }
 0x117   :  { %v351_v59 = vadd.f32 %v350_v48, %v349_v39  ;;  %v375_v62 = vmul.f32 %v1241_v40, %v1241_v40  ;;  %v262_v0 = vadd.f32 %v261_v54, %v260_v43  ;;  %v297_v3 = vmul.f32 %v1237_v31, %v1237_v31 }
 0x118   :  { %v281_v2 = vadd.f32 %v280_v55, %v279_v44  ;;  %v341_v4 = vadd.f32 %v340_v45, %v339_v27  ;;  %v1249_v7 = vmul.f32 0.0625, %v269_v42  ;;  %v333_v9 = vrot.slane %v332_v58, 1 }
 0x119   :  { %v352_v1 = vrot.slane %v351_v59, 2  ;;  %v380_v10 = vsub.f32 %v1227_v11, %v372_v33  ;;  %v390_v12 = vmax.f32 %v382_v53, 0.0  ;;  %v296_v13 = vmul.f32 %v1213_v52, %v1213_v52 }
 0x11a   :  { %v272_v15 = vadd.f32 %v271_v61, %v270_v49  ;;  %v334_v16 = vadd.f32 %v333_v9, %v332_v58  ;;  %v1254_v17 = vmul.f32 0.0625, %v262_v0  ;;  %v282_v18 = vrot.slane %v281_v2, 1 }
 0x11b   :  { %v353_v19 = vadd.f32 %v352_v1, %v351_v59  ;;  %v397_v21 = vadd.f32 1e-05, %v389_v50  ;;  %v383_v22 = vsub.f32 %v367_v57, %v375_v62  ;;  %v342_v23 = vadd.f32 %v297_v3, %v296_v13 }
 0x11c   :  { %v369_v24 = vmul.f32 0.0625, %v341_v4  ;;  %v377_v25 = vmul.f32 %v1249_v7, %v1249_v7  ;;  %v368_v27 = vmul.f32 0.0625, %v334_v16  ;;  %v376_v11 = vmul.f32 %v1254_v17, %v1254_v17 }
 0x11d   :  { %v283_v28 = vadd.f32 %v282_v18, %v281_v2  ;;  %v354_v30 = vrot.slane %v353_v19, 1  ;;  %v273_v33 = vrot.slane %v272_v15, 2  ;;  %v388_v37 = vmax.f32 %v380_v10, 0.0 }
 0x11e   :  { %v398_v38 = vadd.f32 1e-05, %v390_v12  ;;  %v384_v39 = vsub.f32 %v368_v27, %v376_v11  ;;  %v343_v45 = vrot.slane %v342_v23, 4  ;;  %987 = vrsqrt.f32 %v397_v21 }
 0x11f   :  { %v355_v42 = vadd.f32 %v354_v30, %v353_v19  ;;  %v1260_v43 = vmul.f32 0.0625, %v283_v28  ;;  %v274_v44 = vadd.f32 %v273_v33, %v272_v15  ;;  %v391_v47 = vmax.f32 %v383_v22, 0.0  ;;  %v863_v22 = vld [vmem:[%s1326_s2] ss:$0 sm:$0xff] }
 0x120   :  { %v385_v48 = vsub.f32 %v369_v24, %v377_v25  ;;  %v392_v49 = vmax.f32 %v384_v39, 0.0  ;;  %v344_v55 = vadd.f32 %v343_v45, %v342_v23  ;;  %v396_v57 = vadd.f32 1e-05, %v388_v37 }
 0x121   :  { %v371_v50 = vmul.f32 0.0625, %v355_v42  ;;  %v379_v53 = vmul.f32 %v1260_v43, %v1260_v43  ;;  %v275_v54 = vrot.slane %v274_v44, 1  ;;  %989 = vrsqrt.f32 %v398_v38 }
 0x122   :  { %v400_v58 = vadd.f32 1e-05, %v392_v49  ;;  %v345_v62 = vrot.slane %v344_v55, 2  ;;  %v399_v0 = vadd.f32 1e-05, %v391_v47  ;;  %v393_v2 = vmax.f32 %v385_v48, 0.0 }
 0x123   :  { %v387_v59 = vsub.f32 %v371_v50, %v379_v53  ;;  %v276_v61 = vadd.f32 %v275_v54, %v274_v44  ;;  %991 = vrsqrt.f32 %v396_v57  ;;  %v473_v47 = vlaneseq }
 0x124   :  { %v346_v3 = vadd.f32 %v345_v62, %v344_v55  ;;  %993 = vrsqrt.f32 %v400_v58  ;;  %v401_v10 = vadd.f32 1e-05, %v393_v2 }
 0x125   :  { %v395_v4 = vmax.f32 %v387_v59, 0.0  ;;  %v362_v9 = vmul.f32 0.0625, %v276_v61  ;;  %995 = vrsqrt.f32 %v399_v0  ;;  %v1096_v61 = vmov 1966171168  }
 0x126   :  { %v347_v1 = vrot.slane %v346_v3, 1  ;;  %997 = vrsqrt.f32 %v401_v10  ;;  %v524_v62 = vunpack.c.l.s4 %v1096_v61 }
 0x127   :  { %v378_v13 = vmul.f32 %v362_v9, %v362_v9  ;;  %v403_v15 = vadd.f32 1e-05, %v395_v4 }
 0x128   :  { %v348_v12 = vadd.f32 %v347_v1, %v346_v3 }
 0x129   :  { %999 = vrsqrt.f32 %v403_v15 }
 0x12a   :  { %v370_v16 = vmul.f32 0.0625, %v348_v12  ;;  %v525_v12 = vunpack.c.0.s8 %v524_v62 }
 0x12b   :  { %v988_v18 = vpop.eup %987 }
 0x12c   :  { %v386_v19 = vsub.f32 %v370_v16, %v378_v13  ;;  %v420_v25 = vmul.f32 %v988_v18, %v863_v22 }
 0x12e   :  { %v990_v21 = vpop.eup %989  ;;  %v394_v23 = vmax.f32 %v386_v19, 0.0  ;;  %v429_v33 = vmul.f32 %v420_v25, %v1201_v29  ;;  %v474_v29 = vshrl.u32 %v473_v47, 7 }
 0x12f   :  { %v421_v11 = vmul.f32 %v990_v21, %v863_v22 }
 0x130   :  { %v402_v24 = vadd.f32 1e-05, %v394_v23  ;;  %v992_v27 = vpop.eup %991  ;;  %v450_v45 = vrot.slane %v429_v33, 7 }
 0x131   :  { %v994_v28 = vpop.eup %993  ;;  %v419_v37 = vmul.f32 %v992_v27, %v863_v22  ;;  %v430_v38 = vmul.f32 %v421_v11, %v1225_v6 }
 0x132   :  { %1001 = vrsqrt.f32 %v402_v24  ;;  %v996_v30 = vpop.eup %995  ;;  %v423_v39 = vmul.f32 %v994_v28, %v863_v22 }
 0x133   :  { %v422_v42 = vmul.f32 %v996_v30, %v863_v22  ;;  %v998_v44 = vpop.eup %997  ;;  %v428_v48 = vmul.f32 %v419_v37, %v1215_v60  ;;  %v453_v50 = vrot.slane %v430_v38, 6 }
 0x134   :  { %v432_v53 = vmul.f32 %v423_v39, %v1254_v17  ;;  %v424_v55 = vmul.f32 %v998_v44, %v863_v22  ;;  %v1275_v17 = vsub.s32 0, %v474_v29 }
 0x135   :  { %v431_v54 = vmul.f32 %v422_v42, %v1241_v40  ;;  %v452_v57 = vsel %vm451_vm1, %v450_v45, %v428_v48 }
 0x136   :  { %v1000_v49 = vpop.eup %999  ;;  %v455_v6 = vsel %vm454_vm2, %v453_v50, %v452_v57  ;;  %v459_v59 = vrot.slane %v432_v53, 4  ;;  %v433_v60 = vmul.f32 %v424_v55, %v1249_v7  ;;  %v864_v7 = vld [vmem:[%s1327_s3] ss:$0 sm:$0xff]  ;;  %v480_v19 = vrot.slane %v420_v25, %v1275_v17 }
 0x137   :  { %v426_v58 = vmul.f32 %v1000_v49, %v863_v22  ;;  %v456_v2 = vrot.slane %v431_v54, 5  ;;  %v484_v27 = vrot.slane %v421_v11, %v1275_v17  ;;  %v496_v28 = vrot.slane %v424_v55, %v1275_v17 }
 0x138   :  { %v462_v13 = vrot.slane %v433_v60, 3  ;;  %v507_v30 = vmul.f32 %v1153_v34, %v480_v19  ;;  %v508_v33 = vmul.f32 %v1157_v36, %v480_v19 }
 0x139   :  { %v458_v40 = vsel %vm457_vm3, %v456_v2, %v455_v6  ;;  %v435_v4 = vmul.f32 %v426_v58, %v1260_v43  ;;  %v476_v43 = vrot.slane %v419_v37, %v1275_v17  ;;  %v504_v47 = vrot.slane %v426_v58, %v1275_v17 }
 0x13a   :  { %v461_v1 = vsel %vm460_vm4, %v459_v59, %v458_v40  ;;  %v510_v34 = vmul.f32 %v484_v27, %v1185_v63  ;;  %v515_v36 = vmul.f32 %v1193_v8, %v496_v28  ;;  %v509_v53 = vmul.f32 %v484_v27, %v1175_v51 }
 0x13b   :  { %v468_v16 = vrot.slane %v435_v4, 1  ;;  %v464_v18 = vsel %vm463_vm5, %v462_v13, %v461_v1  ;;  %v505_v25 = vmul.f32 %v476_v43, %v1155_v35  ;;  %v506_v45 = vmul.f32 %v476_v43, %v1167_v41 }
 0x13f   :  { %v1002_v0 = vpop.eup %1001 }
 0x140   :  { %v1273_v3 = vmul.f32 %v1002_v0, %v863_v22  ;;  %v528_v22 = vsub.s32 %v525_v12, %v474_v29 }
 0x142   :  { %v434_v10 = vmul.f32 %v1273_v3, %v362_v9  ;;  %v488_v9 = vrot.slane %v422_v42, %v1275_v17  ;;  %v492_v42 = vrot.slane %v423_v39, %v1275_v17  ;;  %v516_v39 = vmul.f32 %v1197_v20, %v496_v28 }
 0x144   :  { %v465_v15 = vrot.slane %v434_v10, 2  ;;  %v511_v37 = vmul.f32 %v1173_v46, %v488_v9  ;;  %v512_v50 = vmul.f32 %v1177_v56, %v488_v9  ;;  %v513_v55 = vmul.f32 %v492_v42, %v1195_v14 }
 0x145   :  { %v514_v29 = vmul.f32 %v492_v42, %v1199_v26  ;;  %v519_v56 = vmul.f32 %v1203_v32, %v504_v47  ;;  %v500_v32 = vrot.slane %v1273_v3, %v1275_v17  ;;  %v520_v42 = vmul.f32 %v1223_v5, %v504_v47  ;;  %v865_v5 = vld [vmem:[%s1329_s5] ss:$0 sm:$0xff]  ;;  %s1097_s5 = smov [#allocation8]  }
 0x146   :  { %v467_v21 = vsel %vm466_vm6, %v465_v15, %v464_v18  ;;  %s840_s17 = sshll.u32 %s1097_s5, 4  ;;  %s841_s17 = int_to_ptr.vmem [resolvable:$true] %s840_s17 }
 0x147   :  { %v470_v23 = vsel %vm469_vm7, %v468_v16, %v467_v21  ;;  %s1063_s18 = scalar_lea.vmem %s841_s17, 2048  ;;  %p1068_p2 = scmp.lt.s32.totalorder %s841_s17, %s841_s17 }
 0x148   :  { %v472_v24 = vsub.f32 %v864_v7, %v470_v23  ;;  %p1064_p1 = scmp.ne.s32.totalorder %s841_s17, %s1063_s18  ;;  %p1069_p3 = scmp.lt.s32.totalorder %s1063_s18, %s1063_s18 }
 0x14a   :  { %v522_v38 = vcombine.high %v472_v24, %v472_v24  ;;  %v529_v44 = vrot.slane %v472_v24, %v528_v22  ;;  %p1070_p4 = por %p1069_p3, %p1068_p2 }
 0x14c   :  { %v536_v48 = vrot.slane %v522_v38, %v528_v22  ;;  %v537_v11 = vcombine.high %v529_v44, %v529_v44  ;;  %v545_v49 = vrot.slane %v529_v44, %v528_v22  ;;  %p1071_p5 = pnand %p1070_p4, %p1064_p1 }
 0x14e   :  { %v552_v35 = vrot.slane %v536_v48, %v528_v22  ;;  %v559_v54 = vrot.slane %v537_v11, %v528_v22  ;;  %v574_v41 = vrot.slane %v545_v49, %v1275_v17  ;;  %v567_v46 = vcombine.high %v545_v49, %v545_v49 }
 0x14f   :  { %v538_v57 = vcombine.high %v536_v48, %v536_v48 }
 0x150   :  { %v611_v58 = vadd.f32 %v574_v41, %v505_v25  ;;  %v612_v63 = vadd.f32 %v574_v41, %v506_v45  ;;  %v578_v8 = vrot.slane %v559_v54, %v1275_v17  ;;  %v568_v6 = vcombine.high %v552_v35, %v552_v35 }
 0x151   :  { %v582_v51 = vrot.slane %v567_v46, %v1275_v17  ;;  %v569_v59 = vcombine.high %v559_v54, %v559_v54  ;;  %v590_v61 = vrot.slane %v552_v35, %v1275_v17  ;;  %v566_v2 = vrot.slane %v538_v57, %v528_v22 }
 0x152   :  { %v627_v62 = vmax.f32 %v611_v58, 0.0  ;;  %v628_v0 = vmax.f32 %v612_v63, 0.0  ;;  %v613_v20 = vadd.f32 %v578_v8, %v507_v30  ;;  %v614_v14 = vadd.f32 %v578_v8, %v508_v33 }
 0x153   :  { %v615_v60 = vadd.f32 %v582_v51, %v509_v53  ;;  %v616_v26 = vadd.f32 %v582_v51, %v510_v34  ;;  %v586_v40 = vrot.slane %v569_v59, %v1275_v17  ;;  %v619_v10 = vadd.f32 %v590_v61, %v513_v55 }
 0x154   :  { %v643_v4 = vpack.c.bf16 %v628_v0, %v627_v62  ;;  %v629_v1 = vmax.f32 %v613_v20, 0.0  ;;  %v630_v12 = vmax.f32 %v614_v14, 0.0  ;;  %v620_v18 = vadd.f32 %v590_v61, %v514_v29 }
 0x155   :  { %v631_v13 = vmax.f32 %v615_v60, 0.0  ;;  %v632_v15 = vmax.f32 %v616_v26, 0.0  ;;  %v617_v16 = vadd.f32 %v586_v40, %v511_v37  ;;  %v618_v7 = vadd.f32 %v586_v40, %v512_v50 }
 0x156   :  { %936 = vmatprep.mubr.bf16.mxu0 %v643_v4  ;;  %v635_v19 = vmax.f32 %v619_v10, 0.0  ;;  %v594_v21 = vrot.slane %v566_v2, %v1275_v17  ;;  %v598_v22 = vrot.slane %v568_v6, %v1275_v17  ;;  %v644_v43 = vpack.c.bf16 %v630_v12, %v629_v1 }
 0x157   :  { %v645_v9 = vpack.c.bf16 %v632_v15, %v631_v13  ;;  %v633_v23 = vmax.f32 %v617_v16, 0.0  ;;  %v634_v24 = vmax.f32 %v618_v7, 0.0  ;;  %v636_v3 = vmax.f32 %v620_v18, 0.0 }
 0x158   :  { %v621_v27 = vadd.f32 %v594_v21, %v515_v36  ;;  %v622_v28 = vadd.f32 %v594_v21, %v516_v39  ;;  %v517_v30 = vmul.f32 %v500_v32, %v1213_v52  ;;  %v518_v33 = vmul.f32 %v500_v32, %v1237_v31  ;;  %937 = vmatmul.mubr.bf16.vlgmr.msra.gmra.mxu0 %v644_v43 }
 0x159   :  { %940 = vmatprep.mubr.bf16.mxu1 %v645_v9  ;;  %v570_v38 = vcombine.high %v566_v2, %v566_v2  ;;  %v646_v44 = vpack.c.bf16 %v634_v24, %v633_v23  ;;  %v647_v25 = vpack.c.bf16 %v636_v3, %v635_v19 }
 0x15a   :  { %v637_v45 = vmax.f32 %v621_v27, 0.0  ;;  %v638_v37 = vmax.f32 %v622_v28, 0.0  ;;  %v624_v48 = vadd.f32 %v598_v22, %v518_v33  ;;  %v623_v11 = vadd.f32 %v598_v22, %v517_v30 }
 0x15b   :  { %v602_v49 = vrot.slane %v570_v38, %v1275_v17  ;;  %941 = vmatmul.mubr.bf16.vlgmr.msra.gmra.mxu1 %v646_v44 }
 0x15c   :  { %v648_v50 = vpack.c.bf16 %v638_v37, %v637_v45  ;;  %944 = vmatprep.mubr.bf16.mxu1 %v647_v25  ;;  %v639_v36 = vmax.f32 %v623_v11, 0.0  ;;  %v640_v31 = vmax.f32 %v624_v48, 0.0 }
 0x15d   :  { %v625_v34 = vadd.f32 %v602_v49, %v519_v56  ;;  %v626_v52 = vadd.f32 %v602_v49, %v520_v42 }
 0x15e   :  { %v649_v41 = vpack.c.bf16 %v640_v31, %v639_v36 }
 0x15f   :  { %v641_v53 = vmax.f32 %v625_v34, 0.0  ;;  %v642_v35 = vmax.f32 %v626_v52, 0.0 }
 0x161   :  { %v650_v54 = vpack.c.bf16 %v642_v35, %v641_v53 }
 0x163   :  { %945 = vmatmul.mubr.bf16.gmra.mxu1 %v648_v50 }
 0x164   :  { %948 = vmatprep.mubr.bf16.mxu1 %v649_v41 }
 0x16b   :  { %949 = vmatmul.mubr.bf16.gmra.mxu1 %v650_v54 }
 0x218   :  { %v938_v47 = vpop.f32.mrf.mxu0 }
 0x219   :  { %v765_v17 = vadd.f32 %v938_v47, %v865_v5 }
 0x21a   :  { %v756_v46 = vpop.f32.mrf.mxu0 }
 0x21b   :  { %821 = vst [vmem:[#allocation8 + $0x10] sm:$0xff] %v765_v17  ;;  %v757_v39 = vadd.f32 %v865_v5, %v756_v46  ;;  %v942_v55 = vpop.f32.mrf.mxu1 }
 0x21c   :  { %v781_v29 = vadd.f32 %v942_v55, %v865_v5  ;;  %v939_v57 = vpop.f32.mrf.mxu0 }
 0x21d   :  { %819 = vst [vmem:[#allocation8] sm:$0xff] %v757_v39  ;;  %v768_v56 = vadd.f32 %v939_v57, %v865_v5  ;;  %v772_v58 = vpop.f32.mrf.mxu1 }
 0x21e   :  { %825 = vst [vmem:[#allocation8 + $0x30] sm:$0xff] %v781_v29  ;;  %v773_v63 = vadd.f32 %v865_v5, %v772_v58  ;;  %v759_v8 = vpop.f32.mrf.mxu0 }
 0x21f   :  { %822 = vst [vmem:[#allocation8 + $0x18] sm:$0xff] %v768_v56  ;;  %v760_v6 = vadd.f32 %v865_v5, %v759_v8  ;;  %v943_v51 = vpop.f32.mrf.mxu1 }
 0x220   :  { %823 = vst [vmem:[#allocation8 + $0x20] sm:$0xff] %v773_v63  ;;  %v784_v59 = vadd.f32 %v943_v51, %v865_v5 }
 0x221   :  { %820 = vst [vmem:[#allocation8 + $0x8] sm:$0xff] %v760_v6  ;;  %v775_v61 = vpop.f32.mrf.mxu1 }
 0x222   :  { %826 = vst [vmem:[#allocation8 + $0x38] sm:$0xff] %v784_v59  ;;  %v776_v62 = vadd.f32 %v865_v5, %v775_v61 }
 0x223   :  { %v946_v0 = vpop.f32.mrf.mxu1 }
 0x224   :  { %824 = vst [vmem:[#allocation8 + $0x28] sm:$0xff] %v776_v62  ;;  %v797_v20 = vadd.f32 %v946_v0, %v865_v5 }
 0x225   :  { %v788_v2 = vpop.f32.mrf.mxu1 }
 0x226   :  { %829 = vst [vmem:[#allocation8 + $0x50] sm:$0xff] %v797_v20  ;;  %v789_v14 = vadd.f32 %v865_v5, %v788_v2 }
 0x227   :  { %v947_v60 = vpop.f32.mrf.mxu1 }
 0x228   :  { %827 = vst [vmem:[#allocation8 + $0x40] sm:$0xff] %v789_v14  ;;  %v800_v26 = vadd.f32 %v947_v60, %v865_v5 }
 0x229   :  { %v791_v40 = vpop.f32.mrf.mxu1 }
 0x22a   :  { %830 = vst [vmem:[#allocation8 + $0x58] sm:$0xff] %v800_v26  ;;  %v792_v32 = vadd.f32 %v865_v5, %v791_v40 }
 0x22b   :  { %v950_v4 = vpop.f32.mrf.mxu1 }
 0x22c   :  { %828 = vst [vmem:[#allocation8 + $0x48] sm:$0xff] %v792_v32  ;;  %v813_v1 = vadd.f32 %v950_v4, %v865_v5 }
 0x22d   :  { %v804_v10 = vpop.f32.mrf.mxu1 }
 0x22e   :  { %833 = vst [vmem:[#allocation8 + $0x70] sm:$0xff] %v813_v1  ;;  %v805_v12 = vadd.f32 %v865_v5, %v804_v10 }
 0x22f   :  { %v951_v13 = vpop.f32.mrf.mxu1 }
 0x230   :  { %831 = vst [vmem:[#allocation8 + $0x60] sm:$0xff] %v805_v12  ;;  %v816_v15 = vadd.f32 %v951_v13, %v865_v5 }
 0x231   :  { %v807_v16 = vpop.f32.mrf.mxu1 }
 0x232   :  { %834 = vst [vmem:[#allocation8 + $0x78] sm:$0xff] %v816_v15  ;;  %v808_v7 = vadd.f32 %v865_v5, %v807_v16 }
 0x234   :  { %832 = vst [vmem:[#allocation8 + $0x68] sm:$0xff] %v808_v7 }
 0x235   :  { %1074 = shalt.err (!%p1071_p5)
}
 0x236   :  { %846 = dma.vmem_to_hbm [thread:$0]  %s841_s17, 2048, %s1330_s6, [#allocation4], %s1093_s7, %s1093_s7, %s1094_s8  }
 0x237   :  { %1087 = dma.done.wait [#allocation4], 2048  }
 0x238   :  { %1088 = vsyncadd [#allocation4], 4294965248 }
 0x239   :  { %850 = vsyncpa [#allocation3], 1 }
 0x23a   :  { %851 = vsyncpa [#allocation6], 1 }
 0x23b   :  { %852 = vsyncpa [#allocation4], 1 }

</bundles_post_ra>
